<compile_context>
chip_gen: v7x
topology: tpu7x:2x2x1
jax: 0.10.0
libtpu: 0.0.40
codegen_flags: <defaults>
</compile_context>

<pallas_src>
import jax
import jax.numpy as jnp
from jax.experimental import pallas as pl
from jax.experimental.pallas import tpu as pltpu

PAD_IDX = 1  # hp.pad_idx


# ------------------------------- helpers -------------------------------------
def _round_up(x, m):
    return ((x + m - 1) // m) * m


def _vmem_capacity_bytes():
    try:
        return int(pltpu.get_tpu_info().vmem_capacity_bytes)
    except Exception:
        return 64 << 20  # conservative fallback (v7x per-core VMEM)


# ~96 MiB on v5e/v6e (128 MiB physical), ~48 MiB on v7x (64 MiB physical):
# leaves headroom for compiler-internal scratch while lifting the small default
# scoped limits (16/32 MiB).
_VMEM_LIMIT = min(int(_vmem_capacity_bytes() * 3 // 4), 96 << 20)


def _pick_tt(T, Bp, Hp, itemsize, cap=64):
    """Timesteps per grid iteration: amortize the ~0.35us per-grid-step overhead,
    stay under the VMEM budget, minimize time padding (TT need NOT divide T),
    and prefer larger TT on ties.  Returns (TT, padded_T)."""
    # residents per grid step: double-buffered whh + bhn + f32 hidden scratch
    fixed = 2 * Hp * 3 * Hp * itemsize + 2 * Hp * 4 + Bp * Hp * 4
    # double-buffered gi (3Hp) + out (Hp) per timestep
    per_t = 2 * Bp * 4 * Hp * itemsize
    budget = max(int(_VMEM_LIMIT * 0.8) - fixed, per_t)
    cap = int(max(1, min(cap, budget // per_t, T)))
    best_tt, best_tp = 1, T
    for tt in range(1, cap + 1):
        tp = ((T + tt - 1) // tt) * tt
        if tp < best_tp or (tp == best_tp and tt > best_tt):
            best_tt, best_tp = tt, tp
    return best_tt, best_tp


def _fuse_gates(w, Hp):
    """(3, A, H) per-gate weights -> (A, 3*Hp); gate g occupies cols [g*Hp, g*Hp+H)."""
    _, A, H = w.shape
    out = jnp.zeros((A, 3 * Hp), w.dtype)
    for g in range(3):
        out = out.at[:, g * Hp:g * Hp + H].set(w[g])
    return out


def _pad_rows(w, Rp):
    return jnp.zeros((Rp,) + w.shape[1:], w.dtype).at[:w.shape[0]].set(w)


# ----------------------------- Pallas kernel ----------------------------------
def _make_gru_kernel(TT, T_actual, Tp):
    """Build the per-(direction, time-chunk) GRU recurrence kernel."""
    needs_mask = Tp > T_actual  # only emit masking code when time padding exists

    def kernel(gi_ref, whh_ref, bhn_ref, out_ref, h_scr):
        # gi_ref : (TT, Bp, 3*Hp) precomputed input projections (biases folded in,
        #          except b_hn which must be gated by r).  Storage dtype (bf16/f32).
        # whh_ref: (Hp, 3*Hp) fused recurrent weights (gate order r,z,n), bf16/f32.
        # bhn_ref: (1, Hp)  hidden bias of the n gate (f32).
        # out_ref: (TT, Bp, Hp) per-timestep hidden states (original time order).
        # h_scr  : (Bp, Hp) f32 carried hidden state (persists across time chunks).
        d = pl.program_id(0)        # 0 = forward, 1 = backward
        c = pl.program_id(1)        # time-chunk counter (processing order)
        nC = pl.num_programs(1)

        @pl.when(c == 0)
        def _():
            h_scr[...] = jnp.zeros_like(h_scr)  # hidden=None -> zero initial state

        whh = whh_ref[...]          # (Hp, 3Hp)
        Hp = whh.shape[0]
        Bp = h_scr.shape[0]
        # hoisted out of the time loop (JAX does not CSE broadcast_in_dim)
        bhn_b = jnp.broadcast_to(bhn_ref[...], (Bp, Hp))
        block_t = c + d * (nC - 1 - 2 * c)      # time-block index in padded array
        t0 = block_t * TT

        def step(i, h):
            # forward (d=0): within-block time index i; backward (d=1): TT-1-i
            ti = i + d * (TT - 1 - 2 * i)
            gi = gi_ref[ti].astype(jnp.float32)                 # (Bp, 3Hp)
            # single fused recurrent matmul: bf16 MXU operands, f32 accumulation
            gh = jnp.dot(h.astype(whh.dtype), whh,
                         preferred_element_type=jnp.float32)    # (Bp, 3Hp)
            # sigmoid via tanh: 1 EUP pass instead of exp + reciprocal
            rz = 0.5 * jnp.tanh(0.5 * (gi[:, :2 * Hp] + gh[:, :2 * Hp])) + 0.5
            r, z = rz[:, :Hp], rz[:, Hp:]
            n = jnp.tanh(gi[:, 2 * Hp:] + r * (gh[:, 2 * Hp:] + bhn_b))
            h_new = n + z * (h - n)                             # == (1-z)*n + z*h
            if needs_mask:
                # padded timesteps must not update h (backward dir hits them first)
                h_new = jnp.where(t0 + ti < T_actual, h_new, h)
            out_ref[ti] = h_new.astype(out_ref.dtype)
            return h_new

        h_scr[...] = jax.lax.fori_loop(0, TT, step, h_scr[...],
                                       unroll=min(TT, 8))

    return kernel


def _gru_bidir(gi, whh, bhn):
    """Both GRU directions of one layer in a single pallas_call.

    gi : (2, T, Bp, 3*Hp) storage-dtype   whh : (2, Hp, 3*Hp)   bhn : (2, 1, Hp) f32
    Returns (2, T, Bp, Hp) storage-dtype hidden states in original time order.
    """
    _, T, Bp, threeHp = gi.shape
    Hp = threeHp // 3
    dtype = gi.dtype
    TT, Tp = _pick_tt(T, Bp, Hp, jnp.dtype(dtype).itemsize)
    if Tp > T:
        gi = jnp.pad(gi, ((0, 0), (0, Tp - T), (0, 0), (0, 0)))
    nC = Tp // TT

    # forward: time block c ; backward: time block nC-1-c (reversal via index math)
    def tmap(d, c):
        return (d, c + d * (nC - 1 - 2 * c), 0, 0)

    def wmap(d, c):
        return (d, 0, 0)

    out = pl.pallas_call(
        _make_gru_kernel(TT, T, Tp),
        out_shape=jax.ShapeDtypeStruct((2, Tp, Bp, Hp), dtype),
        grid_spec=pltpu.PrefetchScalarGridSpec(
            num_scalar_prefetch=0,
            grid=(2, nC),
            in_specs=[
                pl.BlockSpec((None, TT, Bp, threeHp), tmap),   # precomputed gi
                # TODO(synk): pipeline_mode=pl.Buffered(1) on the two constant
                # per-direction blocks below would drop a redundant double buffer;
                # skipped for BlockSpec-signature compatibility.
                pl.BlockSpec((None, Hp, threeHp), wmap),       # fused W_hh
                pl.BlockSpec((None, 1, Hp), wmap),             # b_hn
            ],
            out_specs=pl.BlockSpec((None, TT, Bp, Hp), tmap),
            scratch_shapes=[pltpu.VMEM((Bp, Hp), jnp.float32)],  # carried hidden (f32)
        ),
        compiler_params=pltpu.CompilerParams(
            # direction axis can shard across v7x's two TensorCores;
            # time recurrence must stay sequential.
            dimension_semantics=("parallel", "arbitrary"),
            vmem_limit_bytes=_VMEM_LIMIT),
    )(gi, whh, bhn)
    return out[:, :T] if Tp > T else out


# ------------------------------ Encoder glue ----------------------------------
def init_encoder_params(key, vocab, embed_dim, hidden_dim, n_layers):
    """Raw PyTorch-layout parameters (f32)."""
    params = {}
    key, k_emb = jax.random.split(key)
    emb = jax.random.normal(k_emb, (vocab, embed_dim), jnp.float32)
    emb = emb.at[PAD_IDX].set(0.0)  # nn.Embedding(padding_idx=1)
    params["embed"] = emb

    bound = 1.0 / float(hidden_dim) ** 0.5
    layers = []
    for layer in range(n_layers):
        in_dim = embed_dim if layer == 0 else 2 * hidden_dim
        dirs = []
        for _d in range(2):  # forward, backward
            key, k1, k2, k3, k4 = jax.random.split(key, 5)
            wih = jax.random.uniform(k1, (3, in_dim, hidden_dim), jnp.float32, -bound, bound)
            whh = jax.random.uniform(k2, (3, hidden_dim, hidden_dim), jnp.float32, -bound, bound)
            bih = jax.random.uniform(k3, (3, hidden_dim), jnp.float32, -bound, bound)
            bhh = jax.random.uniform(k4, (3, hidden_dim), jnp.float32, -bound, bound)
            dirs.append((wih, whh, bih, bhh))
        layers.append(dirs)
    params["gru"] = layers
    return params


def prepare_encoder_params(raw, dtype=jnp.bfloat16):
    """One-time weight prep (gate fusing along a lane-padded 3*Hp axis, bias
    folding, row padding, dtype cast).  Done OUTSIDE the jitted forward so no
    per-call re-padding / re-stacking.  Zero padding is exact: padded hidden
    lanes stay identically zero through the recurrence."""
    H = raw["gru"][0][0][1].shape[-1]
    Hp = _round_up(H, 128)
    layers = []
    for li, layer_params in enumerate(raw["gru"]):
        first = li == 0
        whh_s, gib_s, bhn_s, wih_s, wihf_s, wihb_s = [], [], [], [], [], []
        for (wih, whh, bih, bhh) in layer_params:
            wih_fused = _fuse_gates(wih, Hp)                        # (Din, 3Hp)
            whh_s.append(_pad_rows(_fuse_gates(whh, Hp), Hp).astype(dtype))  # (Hp,3Hp)
            # fold b_ih (all gates) + b_hh (r,z gates) into the precomputed projection;
            # b_hn cannot be folded because it is multiplied by r inside the kernel.
            gb = jnp.stack([bih[0] + bhh[0], bih[1] + bhh[1], bih[2]], axis=0)  # (3,H)
            gib_s.append(_fuse_gates(gb[:, None, :], Hp)[0])        # (3Hp,) f32
            bhn_s.append(jnp.zeros((1, Hp), jnp.float32).at[:, :H].set(bhh[2][None, :]))
            if first:
                wih_s.append(wih_fused.astype(dtype))               # (E, 3Hp)
            else:
                wihf_s.append(_pad_rows(wih_fused[:H], Hp).astype(dtype))  # fwd half
                wihb_s.append(_pad_rows(wih_fused[H:], Hp).astype(dtype))  # bwd half
        pp = {"whh": jnp.stack(whh_s), "gi_bias": jnp.stack(gib_s),
              "bhn": jnp.stack(bhn_s)}
        if first:
            pp["wih"] = jnp.stack(wih_s)
        else:
            pp["wih_f"] = jnp.stack(wihf_s)
            pp["wih_b"] = jnp.stack(wihb_s)
        layers.append(pp)
    return {"embed": raw["embed"].astype(dtype), "layers": layers}


def encoder_forward(prepped, source, *, H):
    """source: (T, B) int32 token indices -> (encoder_final, encoder_hidden)."""
    T, B = source.shape
    layers = prepped["layers"]
    dtype = layers[0]["whh"].dtype
    sublane = 16 if dtype == jnp.bfloat16 else 8
    Bp = _round_up(B, sublane)   # sublane-dense batch (16 for bf16 packing)

    # Pad batch with PAD tokens (zero embeddings); batch rows are independent.
    src_p = jnp.pad(source, ((0, 0), (0, Bp - B)), constant_values=PAD_IDX)
    x = prepped["embed"][src_p]                               # (T, Bp, E)

    hiddens = []
    prev = None
    for li, pp in enumerate(layers):
        if li == 0:
            # one big MXU-friendly batched matmul over all T and both directions
            gi = jnp.einsum("tbe,zek->ztbk", x, pp["wih"],
                            preferred_element_type=jnp.float32)
        else:
            # avoid materializing the (T,B,2H) concat: two half matmuls summed
            gi = (jnp.einsum("tbh,zhk->ztbk", prev[0], pp["wih_f"],
                             preferred_element_type=jnp.float32)
                  + jnp.einsum("tbh,zhk->ztbk", prev[1], pp["wih_b"],
                               preferred_element_type=jnp.float32))
        gi = (gi + pp["gi_bias"][:, None, None, :]).astype(dtype)  # (2,T,Bp,3Hp)

        prev = _gru_bidir(gi, pp["whh"], pp["bhn"])           # (2, T, Bp, Hp)
        hiddens.append(prev[0, T - 1, :B, :H].astype(jnp.float32))  # fwd final state
        hiddens.append(prev[1, 0, :B, :H].astype(jnp.float32))      # bwd final state
        # TODO(synk): nn.GRU inter-layer dropout omitted (inference semantics).

    encoder_final = (prev[0, :, :B, :H].astype(jnp.float32)
                     + prev[1, :, :B, :H].astype(jnp.float32))  # (T, B, H)
    encoder_hidden = jnp.stack(hiddens, axis=0)                 # (n_layers*2, B, H)
    return encoder_final, encoder_hidden


# ------------------------- pure-JAX reference check ---------------------------
def _gru_dir_ref(x, wih, whh, bih, bhh, reverse):
    T, B, _ = x.shape
    H = whh.shape[-1]
    xs = x[::-1] if reverse else x

    def step(h, xt):
        gi = jnp.einsum("bd,gdh->gbh", xt, wih) + bih[:, None, :]
        gh = jnp.einsum("bh,ghk->gbk", h, whh) + bhh[:, None, :]
        r = jax.nn.sigmoid(gi[0] + gh[0])
        z = jax.nn.sigmoid(gi[1] + gh[1])
        n = jnp.tanh(gi[2] + r * gh[2])
        h_new = (1.0 - z) * n + z * h
        return h_new, h_new

    _, ys = jax.lax.scan(step, jnp.zeros((B, H), jnp.float32), xs)
    return ys[::-1] if reverse else ys


def encoder_forward_ref(params, source):
    x = params["embed"][source]
    hiddens = []
    for layer_params in params["gru"]:
        outs = []
        for d, (wih, whh, bih, bhh) in enumerate(layer_params):
            o = _gru_dir_ref(x, wih, whh, bih, bhh, reverse=(d == 1))
            outs.append(o)
            hiddens.append(o[-1] if d == 0 else o[0])
        x = jnp.concatenate(outs, axis=-1)
    H = x.shape[-1] // 2
    return x[:, :, :H] + x[:, :, H:], jnp.stack(hiddens, axis=0)


# ----------------------------------- main --------------------------------------
if __name__ == "__main__":
    VOCAB, EMBED, HIDDEN, NLAYERS = 16, 32, 32, 2
    T, B = 8, 2

    key = jax.random.PRNGKey(0)
    kp, ks = jax.random.split(key)
    raw = init_encoder_params(kp, VOCAB, EMBED, HIDDEN, NLAYERS)
    source = jax.random.randint(ks, (T, B), 0, VOCAB, dtype=jnp.int32)

    ref_final, ref_hidden = encoder_forward_ref(raw, source)

    fwd = jax.jit(encoder_forward, static_argnames=("H",))

    # f32 configuration: strict structural/numerical check against the reference.
    p32 = prepare_encoder_params(raw, dtype=jnp.float32)
    f32_final, f32_hidden = fwd(p32, source, H=HIDDEN)
    jax.block_until_ready((f32_final, f32_hidden))
    assert f32_final.shape == (T, B, HIDDEN)
    assert f32_hidden.shape == (2 * NLAYERS, B, HIDDEN)
    assert jnp.allclose(f32_final, ref_final, rtol=1e-3, atol=1e-4), \
        float(jnp.max(jnp.abs(f32_final - ref_final)))
    assert jnp.allclose(f32_hidden, ref_hidden, rtol=1e-3, atol=1e-4), \
        float(jnp.max(jnp.abs(f32_hidden - ref_hidden)))

    # bf16 configuration (the performance path): bf16 MXU operands + bf16 gi/out
    # storage, f32 carried state/accumulation.  Looser tolerance for bf16 rounding.
    pbf = prepare_encoder_params(raw, dtype=jnp.bfloat16)
    bf_final, bf_hidden = fwd(pbf, source, H=HIDDEN)
    jax.block_until_ready((bf_final, bf_hidden))
    assert bf_final.shape == (T, B, HIDDEN)
    assert bf_hidden.shape == (2 * NLAYERS, B, HIDDEN)
    assert float(jnp.max(jnp.abs(bf_final - ref_final))) < 0.1, \
        float(jnp.max(jnp.abs(bf_final - ref_final)))
    assert float(jnp.max(jnp.abs(bf_hidden - ref_hidden))) < 0.1, \
        float(jnp.max(jnp.abs(bf_hidden - ref_hidden)))

    print("KERNEL_OK")
</pallas_src>

<mosaic_0001>
module attributes {stable_mosaic.version = 11 : i64} {
  func.func @kernel(%arg0: i32, %arg1: i32, %arg2: memref<1x8x8x384xf32, #tpu.memory_space<vmem>>, %arg3: memref<1x128x384xf32, #tpu.memory_space<vmem>>, %arg4: memref<1x1x128xf32, #tpu.memory_space<vmem>>, %arg5: memref<1x8x8x128xf32, #tpu.memory_space<vmem>>, %arg6: memref<8x128xf32, #tpu.memory_space<vmem>>) attributes {dimension_semantics = [#tpu.dimension_semantics<parallel>, #tpu.dimension_semantics<arbitrary>], iteration_bounds = array<i64: 2, 1>, scalar_prefetch = 0 : i64, scratch_operands = 1 : i64, tpu.core_type = #tpu.core_type<tc>, window_params = [{transform_indices = @transform_0, window_bounds = array<i64: 1, 8, 8, 384>}, {transform_indices = @transform_1, window_bounds = array<i64: 1, 128, 384>}, {transform_indices = @transform_2, window_bounds = array<i64: 1, 1, 128>}, {transform_indices = @transform_3, window_bounds = array<i64: 1, 8, 8, 128>}]} {
    %c0_i32 = arith.constant 0 : i32
    %0 = arith.cmpi eq, %arg1, %c0_i32 : i32
    %1 = arith.extui %0 : i1 to i32
    %c0_i32_0 = arith.constant 0 : i32
    %2 = arith.cmpi ne, %1, %c0_i32_0 : i32
    scf.if %2 {
      %cst_106 = arith.constant 0.000000e+00 : f32
      %275 = vector.broadcast %cst_106 : f32 to vector<8x128xf32>
      %c0_107 = arith.constant 0 : index
      %c0_108 = arith.constant 0 : index
      %276 = vector.load %arg6[%c0_107, %c0_108] : memref<8x128xf32, #tpu.memory_space<vmem>>, vector<8x128xf32>
      tpu.vector_store %arg6[%c0_107, %c0_108], %275 {strides = array<i32>} : memref<8x128xf32, #tpu.memory_space<vmem>>, vector<8x128xf32>,
    } else {
    }
    %c0 = arith.constant 0 : index
    %c0_1 = arith.constant 0 : index
    %c0_2 = arith.constant 0 : index
    %3 = vector.load %arg3[%c0, %c0_1, %c0_2] : memref<1x128x384xf32, #tpu.memory_space<vmem>>, vector<1x128x384xf32>
    %4 = vector.shape_cast %3 : vector<1x128x384xf32> to vector<128x384xf32>
    %c0_3 = arith.constant 0 : index
    %c0_4 = arith.constant 0 : index
    %c0_5 = arith.constant 0 : index
    %5 = vector.load %arg4[%c0_3, %c0_4, %c0_5] : memref<1x1x128xf32, #tpu.memory_space<vmem>>, vector<1x1x128xf32>
    %6 = vector.shape_cast %5 : vector<1x1x128xf32> to vector<1x128xf32>
    %7 = vector.shape_cast %6 : vector<1x128xf32> to vector<1x128xf32>
    %8 = vector.broadcast %7 : vector<1x128xf32> to vector<8x128xf32>
    %c0_6 = arith.constant 0 : index
    %c0_7 = arith.constant 0 : index
    %9 = vector.load %arg6[%c0_6, %c0_7] : memref<8x128xf32, #tpu.memory_space<vmem>>, vector<8x128xf32>
    %c0_i32_8 = arith.constant 0 : i32
    %c2_i32 = arith.constant 2 : i32
    %10 = arith.muli %c2_i32, %c0_i32_8 : i32
    %c7_i32 = arith.constant 7 : i32
    %11 = arith.subi %c7_i32, %10 : i32
    %12 = arith.muli %arg0, %11 : i32
    %13 = arith.addi %c0_i32_8, %12 : i32
    %c0_9 = arith.constant 0 : index
    %14 = arith.index_cast %13 : i32 to index
    %c0_10 = arith.constant 0 : index
    %c0_11 = arith.constant 0 : index
    %15 = vector.load %arg2[%c0_9, %14, %c0_10, %c0_11] : memref<1x8x8x384xf32, #tpu.memory_space<vmem>>, vector<1x1x8x384xf32>
    %16 = vector.shape_cast %15 : vector<1x1x8x384xf32> to vector<8x384xf32>
    %cst = arith.constant dense<0.000000e+00> : vector<8x384xf32>
    %17 = tpu.matmul %9, %4, %cst {dimension_numbers = #tpu.dot_dimension_numbers<[1], [0], [0], [1], [0, 0, 1, 1], [], []>} : vector<8x128xf32>, vector<128x384xf32>, vector<8x384xf32> -> vector<8x384xf32>
    %18 = vector.extract_strided_slice %16 {offsets = [0, 0], sizes = [8, 256], strides = [1, 1]} : vector<8x384xf32> to vector<8x256xf32>
    %19 = vector.extract_strided_slice %17 {offsets = [0, 0], sizes = [8, 256], strides = [1, 1]} : vector<8x384xf32> to vector<8x256xf32>
    %20 = arith.addf %18, %19 : vector<8x256xf32>
    %cst_12 = arith.constant 5.000000e-01 : f32
    %21 = vector.broadcast %cst_12 : f32 to vector<8x256xf32>
    %22 = arith.mulf %21, %20 : vector<8x256xf32>
    %23 = math.tanh %22 : vector<8x256xf32>
    %cst_13 = arith.constant 5.000000e-01 : f32
    %24 = vector.broadcast %cst_13 : f32 to vector<8x256xf32>
    %25 = arith.mulf %24, %23 : vector<8x256xf32>
    %cst_14 = arith.constant 5.000000e-01 : f32
    %26 = vector.broadcast %cst_14 : f32 to vector<8x256xf32>
    %27 = arith.addf %25, %26 : vector<8x256xf32>
    %28 = vector.extract_strided_slice %27 {offsets = [0, 0], sizes = [8, 128], strides = [1, 1]} : vector<8x256xf32> to vector<8x128xf32>
    %29 = vector.extract_strided_slice %27 {offsets = [0, 128], sizes = [8, 128], strides = [1, 1]} : vector<8x256xf32> to vector<8x128xf32>
    %30 = vector.extract_strided_slice %16 {offsets = [0, 256], sizes = [8, 128], strides = [1, 1]} : vector<8x384xf32> to vector<8x128xf32>
    %31 = vector.extract_strided_slice %17 {offsets = [0, 256], sizes = [8, 128], strides = [1, 1]} : vector<8x384xf32> to vector<8x128xf32>
    %32 = arith.addf %31, %8 : vector<8x128xf32>
    %33 = arith.mulf %28, %32 : vector<8x128xf32>
    %34 = arith.addf %30, %33 : vector<8x128xf32>
    %35 = math.tanh %34 : vector<8x128xf32>
    %36 = arith.subf %9, %35 : vector<8x128xf32>
    %37 = arith.mulf %29, %36 : vector<8x128xf32>
    %38 = arith.addf %35, %37 : vector<8x128xf32>
    %c0_15 = arith.constant 0 : index
    %39 = arith.index_cast %13 : i32 to index
    %c0_16 = arith.constant 0 : index
    %c0_17 = arith.constant 0 : index
    %40 = vector.load %arg5[%c0_15, %39, %c0_16, %c0_17] : memref<1x8x8x128xf32, #tpu.memory_space<vmem>>, vector<1x1x8x128xf32>
    %41 = vector.shape_cast %40 : vector<1x1x8x128xf32> to vector<8x128xf32>
    %42 = vector.shape_cast %38 : vector<8x128xf32> to vector<1x1x8x128xf32>
    tpu.vector_store %arg5[%c0_15, %39, %c0_16, %c0_17], %42 {strides = array<i32>} : memref<1x8x8x128xf32, #tpu.memory_space<vmem>>, vector<1x1x8x128xf32>,
    %c1_i32 = arith.constant 1 : i32
    %c2_i32_18 = arith.constant 2 : i32
    %43 = arith.muli %c2_i32_18, %c1_i32 : i32
    %c7_i32_19 = arith.constant 7 : i32
    %44 = arith.subi %c7_i32_19, %43 : i32
    %45 = arith.muli %arg0, %44 : i32
    %46 = arith.addi %c1_i32, %45 : i32
    %c0_20 = arith.constant 0 : index
    %47 = arith.index_cast %46 : i32 to index
    %c0_21 = arith.constant 0 : index
    %c0_22 = arith.constant 0 : index
    %48 = vector.load %arg2[%c0_20, %47, %c0_21, %c0_22] : memref<1x8x8x384xf32, #tpu.memory_space<vmem>>, vector<1x1x8x384xf32>
    %49 = vector.shape_cast %48 : vector<1x1x8x384xf32> to vector<8x384xf32>
    %cst_23 = arith.constant dense<0.000000e+00> : vector<8x384xf32>
    %50 = tpu.matmul %38, %4, %cst_23 {dimension_numbers = #tpu.dot_dimension_numbers<[1], [0], [0], [1], [0, 0, 1, 1], [], []>} : vector<8x128xf32>, vector<128x384xf32>, vector<8x384xf32> -> vector<8x384xf32>
    %51 = vector.extract_strided_slice %49 {offsets = [0, 0], sizes = [8, 256], strides = [1, 1]} : vector<8x384xf32> to vector<8x256xf32>
    %52 = vector.extract_strided_slice %50 {offsets = [0, 0], sizes = [8, 256], strides = [1, 1]} : vector<8x384xf32> to vector<8x256xf32>
    %53 = arith.addf %51, %52 : vector<8x256xf32>
    %cst_24 = arith.constant 5.000000e-01 : f32
    %54 = vector.broadcast %cst_24 : f32 to vector<8x256xf32>
    %55 = arith.mulf %54, %53 : vector<8x256xf32>
    %56 = math.tanh %55 : vector<8x256xf32>
    %cst_25 = arith.constant 5.000000e-01 : f32
    %57 = vector.broadcast %cst_25 : f32 to vector<8x256xf32>
    %58 = arith.mulf %57, %56 : vector<8x256xf32>
    %cst_26 = arith.constant 5.000000e-01 : f32
    %59 = vector.broadcast %cst_26 : f32 to vector<8x256xf32>
    %60 = arith.addf %58, %59 : vector<8x256xf32>
    %61 = vector.extract_strided_slice %60 {offsets = [0, 0], sizes = [8, 128], strides = [1, 1]} : vector<8x256xf32> to vector<8x128xf32>
    %62 = vector.extract_strided_slice %60 {offsets = [0, 128], sizes = [8, 128], strides = [1, 1]} : vector<8x256xf32> to vector<8x128xf32>
    %63 = vector.extract_strided_slice %49 {offsets = [0, 256], sizes = [8, 128], strides = [1, 1]} : vector<8x384xf32> to vector<8x128xf32>
    %64 = vector.extract_strided_slice %50 {offsets = [0, 256], sizes = [8, 128], strides = [1, 1]} : vector<8x384xf32> to vector<8x128xf32>
    %65 = arith.addf %64, %8 : vector<8x128xf32>
    %66 = arith.mulf %61, %65 : vector<8x128xf32>
    %67 = arith.addf %63, %66 : vector<8x128xf32>
    %68 = math.tanh %67 : vector<8x128xf32>
    %69 = arith.subf %38, %68 : vector<8x128xf32>
    %70 = arith.mulf %62, %69 : vector<8x128xf32>
    %71 = arith.addf %68, %70 : vector<8x128xf32>
    %c0_27 = arith.constant 0 : index
    %72 = arith.index_cast %46 : i32 to index
    %c0_28 = arith.constant 0 : index
    %c0_29 = arith.constant 0 : index
    %73 = vector.load %arg5[%c0_27, %72, %c0_28, %c0_29] : memref<1x8x8x128xf32, #tpu.memory_space<vmem>>, vector<1x1x8x128xf32>
    %74 = vector.shape_cast %73 : vector<1x1x8x128xf32> to vector<8x128xf32>
    %75 = vector.shape_cast %71 : vector<8x128xf32> to vector<1x1x8x128xf32>
    tpu.vector_store %arg5[%c0_27, %72, %c0_28, %c0_29], %75 {strides = array<i32>} : memref<1x8x8x128xf32, #tpu.memory_space<vmem>>, vector<1x1x8x128xf32>,
    %c2_i32_30 = arith.constant 2 : i32
    %c2_i32_31 = arith.constant 2 : i32
    %76 = arith.muli %c2_i32_31, %c2_i32_30 : i32
    %c7_i32_32 = arith.constant 7 : i32
    %77 = arith.subi %c7_i32_32, %76 : i32
    %78 = arith.muli %arg0, %77 : i32
    %79 = arith.addi %c2_i32_30, %78 : i32
    %c0_33 = arith.constant 0 : index
    %80 = arith.index_cast %79 : i32 to index
    %c0_34 = arith.constant 0 : index
    %c0_35 = arith.constant 0 : index
    %81 = vector.load %arg2[%c0_33, %80, %c0_34, %c0_35] : memref<1x8x8x384xf32, #tpu.memory_space<vmem>>, vector<1x1x8x384xf32>
    %82 = vector.shape_cast %81 : vector<1x1x8x384xf32> to vector<8x384xf32>
    %cst_36 = arith.constant dense<0.000000e+00> : vector<8x384xf32>
    %83 = tpu.matmul %71, %4, %cst_36 {dimension_numbers = #tpu.dot_dimension_numbers<[1], [0], [0], [1], [0, 0, 1, 1], [], []>} : vector<8x128xf32>, vector<128x384xf32>, vector<8x384xf32> -> vector<8x384xf32>
    %84 = vector.extract_strided_slice %82 {offsets = [0, 0], sizes = [8, 256], strides = [1, 1]} : vector<8x384xf32> to vector<8x256xf32>
    %85 = vector.extract_strided_slice %83 {offsets = [0, 0], sizes = [8, 256], strides = [1, 1]} : vector<8x384xf32> to vector<8x256xf32>
    %86 = arith.addf %84, %85 : vector<8x256xf32>
    %cst_37 = arith.constant 5.000000e-01 : f32
    %87 = vector.broadcast %cst_37 : f32 to vector<8x256xf32>
    %88 = arith.mulf %87, %86 : vector<8x256xf32>
    %89 = math.tanh %88 : vector<8x256xf32>
    %cst_38 = arith.constant 5.000000e-01 : f32
    %90 = vector.broadcast %cst_38 : f32 to vector<8x256xf32>
    %91 = arith.mulf %90, %89 : vector<8x256xf32>
    %cst_39 = arith.constant 5.000000e-01 : f32
    %92 = vector.broadcast %cst_39 : f32 to vector<8x256xf32>
    %93 = arith.addf %91, %92 : vector<8x256xf32>
    %94 = vector.extract_strided_slice %93 {offsets = [0, 0], sizes = [8, 128], strides = [1, 1]} : vector<8x256xf32> to vector<8x128xf32>
    %95 = vector.extract_strided_slice %93 {offsets = [0, 128], sizes = [8, 128], strides = [1, 1]} : vector<8x256xf32> to vector<8x128xf32>
    %96 = vector.extract_strided_slice %82 {offsets = [0, 256], sizes = [8, 128], strides = [1, 1]} : vector<8x384xf32> to vector<8x128xf32>
    %97 = vector.extract_strided_slice %83 {offsets = [0, 256], sizes = [8, 128], strides = [1, 1]} : vector<8x384xf32> to vector<8x128xf32>
    %98 = arith.addf %97, %8 : vector<8x128xf32>
    %99 = arith.mulf %94, %98 : vector<8x128xf32>
    %100 = arith.addf %96, %99 : vector<8x128xf32>
    %101 = math.tanh %100 : vector<8x128xf32>
    %102 = arith.subf %71, %101 : vector<8x128xf32>
    %103 = arith.mulf %95, %102 : vector<8x128xf32>
    %104 = arith.addf %101, %103 : vector<8x128xf32>
    %c0_40 = arith.constant 0 : index
    %105 = arith.index_cast %79 : i32 to index
    %c0_41 = arith.constant 0 : index
    %c0_42 = arith.constant 0 : index
    %106 = vector.load %arg5[%c0_40, %105, %c0_41, %c0_42] : memref<1x8x8x128xf32, #tpu.memory_space<vmem>>, vector<1x1x8x128xf32>
    %107 = vector.shape_cast %106 : vector<1x1x8x128xf32> to vector<8x128xf32>
    %108 = vector.shape_cast %104 : vector<8x128xf32> to vector<1x1x8x128xf32>
    tpu.vector_store %arg5[%c0_40, %105, %c0_41, %c0_42], %108 {strides = array<i32>} : memref<1x8x8x128xf32, #tpu.memory_space<vmem>>, vector<1x1x8x128xf32>,
    %c3_i32 = arith.constant 3 : i32
    %c2_i32_43 = arith.constant 2 : i32
    %109 = arith.muli %c2_i32_43, %c3_i32 : i32
    %c7_i32_44 = arith.constant 7 : i32
    %110 = arith.subi %c7_i32_44, %109 : i32
    %111 = arith.muli %arg0, %110 : i32
    %112 = arith.addi %c3_i32, %111 : i32
    %c0_45 = arith.constant 0 : index
    %113 = arith.index_cast %112 : i32 to index
    %c0_46 = arith.constant 0 : index
    %c0_47 = arith.constant 0 : index
    %114 = vector.load %arg2[%c0_45, %113, %c0_46, %c0_47] : memref<1x8x8x384xf32, #tpu.memory_space<vmem>>, vector<1x1x8x384xf32>
    %115 = vector.shape_cast %114 : vector<1x1x8x384xf32> to vector<8x384xf32>
    %cst_48 = arith.constant dense<0.000000e+00> : vector<8x384xf32>
    %116 = tpu.matmul %104, %4, %cst_48 {dimension_numbers = #tpu.dot_dimension_numbers<[1], [0], [0], [1], [0, 0, 1, 1], [], []>} : vector<8x128xf32>, vector<128x384xf32>, vector<8x384xf32> -> vector<8x384xf32>
    %117 = vector.extract_strided_slice %115 {offsets = [0, 0], sizes = [8, 256], strides = [1, 1]} : vector<8x384xf32> to vector<8x256xf32>
    %118 = vector.extract_strided_slice %116 {offsets = [0, 0], sizes = [8, 256], strides = [1, 1]} : vector<8x384xf32> to vector<8x256xf32>
    %119 = arith.addf %117, %118 : vector<8x256xf32>
    %cst_49 = arith.constant 5.000000e-01 : f32
    %120 = vector.broadcast %cst_49 : f32 to vector<8x256xf32>
    %121 = arith.mulf %120, %119 : vector<8x256xf32>
    %122 = math.tanh %121 : vector<8x256xf32>
    %cst_50 = arith.constant 5.000000e-01 : f32
    %123 = vector.broadcast %cst_50 : f32 to vector<8x256xf32>
    %124 = arith.mulf %123, %122 : vector<8x256xf32>
    %cst_51 = arith.constant 5.000000e-01 : f32
    %125 = vector.broadcast %cst_51 : f32 to vector<8x256xf32>
    %126 = arith.addf %124, %125 : vector<8x256xf32>
    %127 = vector.extract_strided_slice %126 {offsets = [0, 0], sizes = [8, 128], strides = [1, 1]} : vector<8x256xf32> to vector<8x128xf32>
    %128 = vector.extract_strided_slice %126 {offsets = [0, 128], sizes = [8, 128], strides = [1, 1]} : vector<8x256xf32> to vector<8x128xf32>
    %129 = vector.extract_strided_slice %115 {offsets = [0, 256], sizes = [8, 128], strides = [1, 1]} : vector<8x384xf32> to vector<8x128xf32>
    %130 = vector.extract_strided_slice %116 {offsets = [0, 256], sizes = [8, 128], strides = [1, 1]} : vector<8x384xf32> to vector<8x128xf32>
    %131 = arith.addf %130, %8 : vector<8x128xf32>
    %132 = arith.mulf %127, %131 : vector<8x128xf32>
    %133 = arith.addf %129, %132 : vector<8x128xf32>
    %134 = math.tanh %133 : vector<8x128xf32>
    %135 = arith.subf %104, %134 : vector<8x128xf32>
    %136 = arith.mulf %128, %135 : vector<8x128xf32>
    %137 = arith.addf %134, %136 : vector<8x128xf32>
    %c0_52 = arith.constant 0 : index
    %138 = arith.index_cast %112 : i32 to index
    %c0_53 = arith.constant 0 : index
    %c0_54 = arith.constant 0 : index
    %139 = vector.load %arg5[%c0_52, %138, %c0_53, %c0_54] : memref<1x8x8x128xf32, #tpu.memory_space<vmem>>, vector<1x1x8x128xf32>
    %140 = vector.shape_cast %139 : vector<1x1x8x128xf32> to vector<8x128xf32>
    %141 = vector.shape_cast %137 : vector<8x128xf32> to vector<1x1x8x128xf32>
    tpu.vector_store %arg5[%c0_52, %138, %c0_53, %c0_54], %141 {strides = array<i32>} : memref<1x8x8x128xf32, #tpu.memory_space<vmem>>, vector<1x1x8x128xf32>,
    %c4_i32 = arith.constant 4 : i32
    %c2_i32_55 = arith.constant 2 : i32
    %142 = arith.muli %c2_i32_55, %c4_i32 : i32
    %c7_i32_56 = arith.constant 7 : i32
    %143 = arith.subi %c7_i32_56, %142 : i32
    %144 = arith.muli %arg0, %143 : i32
    %145 = arith.addi %c4_i32, %144 : i32
    %c0_57 = arith.constant 0 : index
    %146 = arith.index_cast %145 : i32 to index
    %c0_58 = arith.constant 0 : index
    %c0_59 = arith.constant 0 : index
    %147 = vector.load %arg2[%c0_57, %146, %c0_58, %c0_59] : memref<1x8x8x384xf32, #tpu.memory_space<vmem>>, vector<1x1x8x384xf32>
    %148 = vector.shape_cast %147 : vector<1x1x8x384xf32> to vector<8x384xf32>
    %cst_60 = arith.constant dense<0.000000e+00> : vector<8x384xf32>
    %149 = tpu.matmul %137, %4, %cst_60 {dimension_numbers = #tpu.dot_dimension_numbers<[1], [0], [0], [1], [0, 0, 1, 1], [], []>} : vector<8x128xf32>, vector<128x384xf32>, vector<8x384xf32> -> vector<8x384xf32>
    %150 = vector.extract_strided_slice %148 {offsets = [0, 0], sizes = [8, 256], strides = [1, 1]} : vector<8x384xf32> to vector<8x256xf32>
    %151 = vector.extract_strided_slice %149 {offsets = [0, 0], sizes = [8, 256], strides = [1, 1]} : vector<8x384xf32> to vector<8x256xf32>
    %152 = arith.addf %150, %151 : vector<8x256xf32>
    %cst_61 = arith.constant 5.000000e-01 : f32
    %153 = vector.broadcast %cst_61 : f32 to vector<8x256xf32>
    %154 = arith.mulf %153, %152 : vector<8x256xf32>
    %155 = math.tanh %154 : vector<8x256xf32>
    %cst_62 = arith.constant 5.000000e-01 : f32
    %156 = vector.broadcast %cst_62 : f32 to vector<8x256xf32>
    %157 = arith.mulf %156, %155 : vector<8x256xf32>
    %cst_63 = arith.constant 5.000000e-01 : f32
    %158 = vector.broadcast %cst_63 : f32 to vector<8x256xf32>
    %159 = arith.addf %157, %158 : vector<8x256xf32>
    %160 = vector.extract_strided_slice %159 {offsets = [0, 0], sizes = [8, 128], strides = [1, 1]} : vector<8x256xf32> to vector<8x128xf32>
    %161 = vector.extract_strided_slice %159 {offsets = [0, 128], sizes = [8, 128], strides = [1, 1]} : vector<8x256xf32> to vector<8x128xf32>
    %162 = vector.extract_strided_slice %148 {offsets = [0, 256], sizes = [8, 128], strides = [1, 1]} : vector<8x384xf32> to vector<8x128xf32>
    %163 = vector.extract_strided_slice %149 {offsets = [0, 256], sizes = [8, 128], strides = [1, 1]} : vector<8x384xf32> to vector<8x128xf32>
    %164 = arith.addf %163, %8 : vector<8x128xf32>
    %165 = arith.mulf %160, %164 : vector<8x128xf32>
    %166 = arith.addf %162, %165 : vector<8x128xf32>
    %167 = math.tanh %166 : vector<8x128xf32>
    %168 = arith.subf %137, %167 : vector<8x128xf32>
    %169 = arith.mulf %161, %168 : vector<8x128xf32>
    %170 = arith.addf %167, %169 : vector<8x128xf32>
    %c0_64 = arith.constant 0 : index
    %171 = arith.index_cast %145 : i32 to index
    %c0_65 = arith.constant 0 : index
    %c0_66 = arith.constant 0 : index
    %172 = vector.load %arg5[%c0_64, %171, %c0_65, %c0_66] : memref<1x8x8x128xf32, #tpu.memory_space<vmem>>, vector<1x1x8x128xf32>
    %173 = vector.shape_cast %172 : vector<1x1x8x128xf32> to vector<8x128xf32>
    %174 = vector.shape_cast %170 : vector<8x128xf32> to vector<1x1x8x128xf32>
    tpu.vector_store %arg5[%c0_64, %171, %c0_65, %c0_66], %174 {strides = array<i32>} : memref<1x8x8x128xf32, #tpu.memory_space<vmem>>, vector<1x1x8x128xf32>,
    %c5_i32 = arith.constant 5 : i32
    %c2_i32_67 = arith.constant 2 : i32
    %175 = arith.muli %c2_i32_67, %c5_i32 : i32
    %c7_i32_68 = arith.constant 7 : i32
    %176 = arith.subi %c7_i32_68, %175 : i32
    %177 = arith.muli %arg0, %176 : i32
    %178 = arith.addi %c5_i32, %177 : i32
    %c0_69 = arith.constant 0 : index
    %179 = arith.index_cast %178 : i32 to index
    %c0_70 = arith.constant 0 : index
    %c0_71 = arith.constant 0 : index
    %180 = vector.load %arg2[%c0_69, %179, %c0_70, %c0_71] : memref<1x8x8x384xf32, #tpu.memory_space<vmem>>, vector<1x1x8x384xf32>
    %181 = vector.shape_cast %180 : vector<1x1x8x384xf32> to vector<8x384xf32>
    %cst_72 = arith.constant dense<0.000000e+00> : vector<8x384xf32>
    %182 = tpu.matmul %170, %4, %cst_72 {dimension_numbers = #tpu.dot_dimension_numbers<[1], [0], [0], [1], [0, 0, 1, 1], [], []>} : vector<8x128xf32>, vector<128x384xf32>, vector<8x384xf32> -> vector<8x384xf32>
    %183 = vector.extract_strided_slice %181 {offsets = [0, 0], sizes = [8, 256], strides = [1, 1]} : vector<8x384xf32> to vector<8x256xf32>
    %184 = vector.extract_strided_slice %182 {offsets = [0, 0], sizes = [8, 256], strides = [1, 1]} : vector<8x384xf32> to vector<8x256xf32>
    %185 = arith.addf %183, %184 : vector<8x256xf32>
    %cst_73 = arith.constant 5.000000e-01 : f32
    %186 = vector.broadcast %cst_73 : f32 to vector<8x256xf32>
    %187 = arith.mulf %186, %185 : vector<8x256xf32>
    %188 = math.tanh %187 : vector<8x256xf32>
    %cst_74 = arith.constant 5.000000e-01 : f32
    %189 = vector.broadcast %cst_74 : f32 to vector<8x256xf32>
    %190 = arith.mulf %189, %188 : vector<8x256xf32>
    %cst_75 = arith.constant 5.000000e-01 : f32
    %191 = vector.broadcast %cst_75 : f32 to vector<8x256xf32>
    %192 = arith.addf %190, %191 : vector<8x256xf32>
    %193 = vector.extract_strided_slice %192 {offsets = [0, 0], sizes = [8, 128], strides = [1, 1]} : vector<8x256xf32> to vector<8x128xf32>
    %194 = vector.extract_strided_slice %192 {offsets = [0, 128], sizes = [8, 128], strides = [1, 1]} : vector<8x256xf32> to vector<8x128xf32>
    %195 = vector.extract_strided_slice %181 {offsets = [0, 256], sizes = [8, 128], strides = [1, 1]} : vector<8x384xf32> to vector<8x128xf32>
    %196 = vector.extract_strided_slice %182 {offsets = [0, 256], sizes = [8, 128], strides = [1, 1]} : vector<8x384xf32> to vector<8x128xf32>
    %197 = arith.addf %196, %8 : vector<8x128xf32>
    %198 = arith.mulf %193, %197 : vector<8x128xf32>
    %199 = arith.addf %195, %198 : vector<8x128xf32>
    %200 = math.tanh %199 : vector<8x128xf32>
    %201 = arith.subf %170, %200 : vector<8x128xf32>
    %202 = arith.mulf %194, %201 : vector<8x128xf32>
    %203 = arith.addf %200, %202 : vector<8x128xf32>
    %c0_76 = arith.constant 0 : index
    %204 = arith.index_cast %178 : i32 to index
    %c0_77 = arith.constant 0 : index
    %c0_78 = arith.constant 0 : index
    %205 = vector.load %arg5[%c0_76, %204, %c0_77, %c0_78] : memref<1x8x8x128xf32, #tpu.memory_space<vmem>>, vector<1x1x8x128xf32>
    %206 = vector.shape_cast %205 : vector<1x1x8x128xf32> to vector<8x128xf32>
    %207 = vector.shape_cast %203 : vector<8x128xf32> to vector<1x1x8x128xf32>
    tpu.vector_store %arg5[%c0_76, %204, %c0_77, %c0_78], %207 {strides = array<i32>} : memref<1x8x8x128xf32, #tpu.memory_space<vmem>>, vector<1x1x8x128xf32>,
    %c6_i32 = arith.constant 6 : i32
    %c2_i32_79 = arith.constant 2 : i32
    %208 = arith.muli %c2_i32_79, %c6_i32 : i32
    %c7_i32_80 = arith.constant 7 : i32
    %209 = arith.subi %c7_i32_80, %208 : i32
    %210 = arith.muli %arg0, %209 : i32
    %211 = arith.addi %c6_i32, %210 : i32
    %c0_81 = arith.constant 0 : index
    %212 = arith.index_cast %211 : i32 to index
    %c0_82 = arith.constant 0 : index
    %c0_83 = arith.constant 0 : index
    %213 = vector.load %arg2[%c0_81, %212, %c0_82, %c0_83] : memref<1x8x8x384xf32, #tpu.memory_space<vmem>>, vector<1x1x8x384xf32>
    %214 = vector.shape_cast %213 : vector<1x1x8x384xf32> to vector<8x384xf32>
    %cst_84 = arith.constant dense<0.000000e+00> : vector<8x384xf32>
    %215 = tpu.matmul %203, %4, %cst_84 {dimension_numbers = #tpu.dot_dimension_numbers<[1], [0], [0], [1], [0, 0, 1, 1], [], []>} : vector<8x128xf32>, vector<128x384xf32>, vector<8x384xf32> -> vector<8x384xf32>
    %216 = vector.extract_strided_slice %214 {offsets = [0, 0], sizes = [8, 256], strides = [1, 1]} : vector<8x384xf32> to vector<8x256xf32>
    %217 = vector.extract_strided_slice %215 {offsets = [0, 0], sizes = [8, 256], strides = [1, 1]} : vector<8x384xf32> to vector<8x256xf32>
    %218 = arith.addf %216, %217 : vector<8x256xf32>
    %cst_85 = arith.constant 5.000000e-01 : f32
    %219 = vector.broadcast %cst_85 : f32 to vector<8x256xf32>
    %220 = arith.mulf %219, %218 : vector<8x256xf32>
    %221 = math.tanh %220 : vector<8x256xf32>
    %cst_86 = arith.constant 5.000000e-01 : f32
    %222 = vector.broadcast %cst_86 : f32 to vector<8x256xf32>
    %223 = arith.mulf %222, %221 : vector<8x256xf32>
    %cst_87 = arith.constant 5.000000e-01 : f32
    %224 = vector.broadcast %cst_87 : f32 to vector<8x256xf32>
    %225 = arith.addf %223, %224 : vector<8x256xf32>
    %226 = vector.extract_strided_slice %225 {offsets = [0, 0], sizes = [8, 128], strides = [1, 1]} : vector<8x256xf32> to vector<8x128xf32>
    %227 = vector.extract_strided_slice %225 {offsets = [0, 128], sizes = [8, 128], strides = [1, 1]} : vector<8x256xf32> to vector<8x128xf32>
    %228 = vector.extract_strided_slice %214 {offsets = [0, 256], sizes = [8, 128], strides = [1, 1]} : vector<8x384xf32> to vector<8x128xf32>
    %229 = vector.extract_strided_slice %215 {offsets = [0, 256], sizes = [8, 128], strides = [1, 1]} : vector<8x384xf32> to vector<8x128xf32>
    %230 = arith.addf %229, %8 : vector<8x128xf32>
    %231 = arith.mulf %226, %230 : vector<8x128xf32>
    %232 = arith.addf %228, %231 : vector<8x128xf32>
    %233 = math.tanh %232 : vector<8x128xf32>
    %234 = arith.subf %203, %233 : vector<8x128xf32>
    %235 = arith.mulf %227, %234 : vector<8x128xf32>
    %236 = arith.addf %233, %235 : vector<8x128xf32>
    %c0_88 = arith.constant 0 : index
    %237 = arith.index_cast %211 : i32 to index
    %c0_89 = arith.constant 0 : index
    %c0_90 = arith.constant 0 : index
    %238 = vector.load %arg5[%c0_88, %237, %c0_89, %c0_90] : memref<1x8x8x128xf32, #tpu.memory_space<vmem>>, vector<1x1x8x128xf32>
    %239 = vector.shape_cast %238 : vector<1x1x8x128xf32> to vector<8x128xf32>
    %240 = vector.shape_cast %236 : vector<8x128xf32> to vector<1x1x8x128xf32>
    tpu.vector_store %arg5[%c0_88, %237, %c0_89, %c0_90], %240 {strides = array<i32>} : memref<1x8x8x128xf32, #tpu.memory_space<vmem>>, vector<1x1x8x128xf32>,
    %c7_i32_91 = arith.constant 7 : i32
    %c2_i32_92 = arith.constant 2 : i32
    %241 = arith.muli %c2_i32_92, %c7_i32_91 : i32
    %c7_i32_93 = arith.constant 7 : i32
    %242 = arith.subi %c7_i32_93, %241 : i32
    %243 = arith.muli %arg0, %242 : i32
    %244 = arith.addi %c7_i32_91, %243 : i32
    %c0_94 = arith.constant 0 : index
    %245 = arith.index_cast %244 : i32 to index
    %c0_95 = arith.constant 0 : index
    %c0_96 = arith.constant 0 : index
    %246 = vector.load %arg2[%c0_94, %245, %c0_95, %c0_96] : memref<1x8x8x384xf32, #tpu.memory_space<vmem>>, vector<1x1x8x384xf32>
    %247 = vector.shape_cast %246 : vector<1x1x8x384xf32> to vector<8x384xf32>
    %cst_97 = arith.constant dense<0.000000e+00> : vector<8x384xf32>
    %248 = tpu.matmul %236, %4, %cst_97 {dimension_numbers = #tpu.dot_dimension_numbers<[1], [0], [0], [1], [0, 0, 1, 1], [], []>} : vector<8x128xf32>, vector<128x384xf32>, vector<8x384xf32> -> vector<8x384xf32>
    %249 = vector.extract_strided_slice %247 {offsets = [0, 0], sizes = [8, 256], strides = [1, 1]} : vector<8x384xf32> to vector<8x256xf32>
    %250 = vector.extract_strided_slice %248 {offsets = [0, 0], sizes = [8, 256], strides = [1, 1]} : vector<8x384xf32> to vector<8x256xf32>
    %251 = arith.addf %249, %250 : vector<8x256xf32>
    %cst_98 = arith.constant 5.000000e-01 : f32
    %252 = vector.broadcast %cst_98 : f32 to vector<8x256xf32>
    %253 = arith.mulf %252, %251 : vector<8x256xf32>
    %254 = math.tanh %253 : vector<8x256xf32>
    %cst_99 = arith.constant 5.000000e-01 : f32
    %255 = vector.broadcast %cst_99 : f32 to vector<8x256xf32>
    %256 = arith.mulf %255, %254 : vector<8x256xf32>
    %cst_100 = arith.constant 5.000000e-01 : f32
    %257 = vector.broadcast %cst_100 : f32 to vector<8x256xf32>
    %258 = arith.addf %256, %257 : vector<8x256xf32>
    %259 = vector.extract_strided_slice %258 {offsets = [0, 0], sizes = [8, 128], strides = [1, 1]} : vector<8x256xf32> to vector<8x128xf32>
    %260 = vector.extract_strided_slice %258 {offsets = [0, 128], sizes = [8, 128], strides = [1, 1]} : vector<8x256xf32> to vector<8x128xf32>
    %261 = vector.extract_strided_slice %247 {offsets = [0, 256], sizes = [8, 128], strides = [1, 1]} : vector<8x384xf32> to vector<8x128xf32>
    %262 = vector.extract_strided_slice %248 {offsets = [0, 256], sizes = [8, 128], strides = [1, 1]} : vector<8x384xf32> to vector<8x128xf32>
    %263 = arith.addf %262, %8 : vector<8x128xf32>
    %264 = arith.mulf %259, %263 : vector<8x128xf32>
    %265 = arith.addf %261, %264 : vector<8x128xf32>
    %266 = math.tanh %265 : vector<8x128xf32>
    %267 = arith.subf %236, %266 : vector<8x128xf32>
    %268 = arith.mulf %260, %267 : vector<8x128xf32>
    %269 = arith.addf %266, %268 : vector<8x128xf32>
    %c0_101 = arith.constant 0 : index
    %270 = arith.index_cast %244 : i32 to index
    %c0_102 = arith.constant 0 : index
    %c0_103 = arith.constant 0 : index
    %271 = vector.load %arg5[%c0_101, %270, %c0_102, %c0_103] : memref<1x8x8x128xf32, #tpu.memory_space<vmem>>, vector<1x1x8x128xf32>
    %272 = vector.shape_cast %271 : vector<1x1x8x128xf32> to vector<8x128xf32>
    %273 = vector.shape_cast %269 : vector<8x128xf32> to vector<1x1x8x128xf32>
    tpu.vector_store %arg5[%c0_101, %270, %c0_102, %c0_103], %273 {strides = array<i32>} : memref<1x8x8x128xf32, #tpu.memory_space<vmem>>, vector<1x1x8x128xf32>,
    %c8_i32 = arith.constant 8 : i32
    %c0_104 = arith.constant 0 : index
    %c0_105 = arith.constant 0 : index
    %274 = vector.load %arg6[%c0_104, %c0_105] : memref<8x128xf32, #tpu.memory_space<vmem>>, vector<8x128xf32>
    tpu.vector_store %arg6[%c0_104, %c0_105], %269 {strides = array<i32>} : memref<8x128xf32, #tpu.memory_space<vmem>>, vector<8x128xf32>,
    return
  }
  func.func @transform_0(%arg0: i32, %arg1: i32) -> (i32, i32, i32, i32) {
    %c2_i32 = arith.constant 2 : i32
    %0 = arith.muli %c2_i32, %arg1 : i32
    %c0_i32 = arith.constant 0 : i32
    %1 = arith.subi %c0_i32, %0 : i32
    %2 = arith.muli %arg0, %1 : i32
    %3 = arith.addi %arg1, %2 : i32
    %c0_i32_0 = arith.constant 0 : i32
    %c0_i32_1 = arith.constant 0 : i32
    %c0_i32_2 = arith.constant 0 : i32
    return %arg0, %3, %c0_i32_0, %c0_i32_1 : i32, i32, i32, i32
  }
  func.func @transform_1(%arg0: i32, %arg1: i32) -> (i32, i32, i32) {
    %c0_i32 = arith.constant 0 : i32
    %c0_i32_0 = arith.constant 0 : i32
    %c0_i32_1 = arith.constant 0 : i32
    return %arg0, %c0_i32, %c0_i32_0 : i32, i32, i32
  }
  func.func @transform_2(%arg0: i32, %arg1: i32) -> (i32, i32, i32) {
    %c0_i32 = arith.constant 0 : i32
    %c0_i32_0 = arith.constant 0 : i32
    %c0_i32_1 = arith.constant 0 : i32
    return %arg0, %c0_i32, %c0_i32_0 : i32, i32, i32
  }
  func.func @transform_3(%arg0: i32, %arg1: i32) -> (i32, i32, i32, i32) {
    %c2_i32 = arith.constant 2 : i32
    %0 = arith.muli %c2_i32, %arg1 : i32
    %c0_i32 = arith.constant 0 : i32
    %1 = arith.subi %c0_i32, %0 : i32
    %2 = arith.muli %arg0, %1 : i32
    %3 = arith.addi %arg1, %2 : i32
    %c0_i32_0 = arith.constant 0 : i32
    %c0_i32_1 = arith.constant 0 : i32
    %c0_i32_2 = arith.constant 0 : i32
    return %arg0, %3, %c0_i32_0, %c0_i32_1 : i32, i32, i32, i32
  }
}

</mosaic_0001>

<bundles_post_ra>
// kernel: encoder_forward.2
= control target key start
LH: loop header
LB: loop body
LE: loop exit
PB: predicated region body
PF: predicated region fallthrough
CT: control target
= control target key end

     0   :  { %s2926_s12 = smov 0   ;;  %s2928_s13 = smov 0   ;;  %s3439_s0 = inlined_call_operand.vmem [shape: f32[2,8,8,384], index: 0, kind: input, shape index: {}]   ;;  %s3440_s1 = inlined_call_operand.vmem [shape: f32[2,128,384], index: 1, kind: input, shape index: {}]   ;;  %s3441_s2 = inlined_call_operand.vmem [shape: f32[2,1,128], index: 2, kind: input, shape index: {}]   ;;  %s3442_s3 = inlined_call_operand.vmem [shape: f32[2,8,8,128], index: 3, kind: output, shape index: {}]  }
   0x1   :  { %s2930_s14 = smov 0  }
   0x2 LB: > { %s25_s15 = sadd.s32 1, %s2897_s13  ;;  %p1887_p0 = scmp.ge.s32.totalorder %s2901_s14, 1  ;;  %s2901_s14 = sphi %s2930_s14, %s13_s14   ;;  %s2897_s13 = sphi %s2928_s13, %s3444_s13   ;;  %s2893_s12 = sphi %s2926_s12, %s3443_s12  }
   0x3   : > { %p27_p1 = scmp.ge.s32.totalorder %s25_s15, 2  ;;  %p201_p2 = scmp.lt.s32.totalorder %s2901_s14, 3 }
   0x5   : > { %s3446_s15 = smov (%p27_p1, %s25_s15), 0  ;;  %p202_p3 = pnand %p1887_p0, %p201_p2 }
   0x6   : > { %p255_p4 = scmp.lt.s32.totalorder (!%p202_p3), %s2893_s12, 1  ;;  %v2903_v0 = vmov (!%p202_p3), 0.0|0.0   ;;  %v2904_v1 = vmov (!%p202_p3), 0.0   ;;  %vm2905_vm0 = vmmov (!%p202_p3), 0   ;;  %s1936_s22 = smul.u32 (!%p202_p3), 168, %s2893_s12 }
   0x7   : > { %205 = sbr.rel (%p202_p3) target bundleno = 2071 (0x817), region = 32  ;;  %2386 = vmatprep.subr.bf16.mxu1 (!%p202_p3), %v2903_v0  ;;  %427 = vmatprep.mubr.f32.mxu0 (!%p202_p3), %v2904_v1  ;;  %s1030_s24 = ssub.s32 (!%p202_p3), 4, %s2893_s12 }
   0x8   : > { %2106 = vmatprep.mubr.msk.f32.mxu1 (!%p202_p3), %vm2905_vm0, %v2904_v1  ;;  %s1895_s4 = smul.u32 (!%p202_p3), 56, %s2893_s12  ;;  %s1914_s28 = sshll.u32 (!%p202_p3), %s1030_s24, 3 }
   0x9   : > { %s1896_s9 = smul.u32 (!%p202_p3), 120, %s2893_s12 }
   0xa   : > { %s1900_s11 = smul.u32 (!%p202_p3), 40, %s2893_s12 }
   0xb   : > { %s1906_s19 = smul.u32 (!%p202_p3), 24, %s2893_s12 }
   0xc   : > { %s1919_s5 = smul.u32 (!%p202_p3), 4294967272, %s2893_s12 }
   0xe   : > { %s2950_s16 = scalar_select %p255_p4, %s2893_s12, 1 }
  0x10   : > { %s2803_s17 = smul.u32 384, %s2950_s16  ;;  %s276_s29 = scalar_lea.vmem %s3441_s2, %s2950_s16 }
  0x11   : > { %s2802_s21 = smul.u32 192, %s2950_s16  ;;  %s1935_s30 = sshll.u32 %s2950_s16, 6 }
  0x12   : > { %s2958_s20 = scalar_lea.vmem %s3440_s1, %s2803_s17  ;;  %s3146_s7 = scalar_lea.vmem %s3442_s3, %s1935_s30 }
  0x13   : > { %v301_v2 = vld [vmem:[%s2958_s20 + $0x8] sm:$0xff]  ;;  %v304_v3 = vld [vmem:[%s2958_s20 + $0x20] sm:$0xff]  ;;  %v303_v6 = vld [vmem:[%s2958_s20 + $0x18] sm:$0xff]  ;;  %s3131_s25 = scalar_lea.vmem %s3439_s0, %s2802_s21  ;;  %s522_s8 = scalar_lea.vmem %s3146_s7, %s1895_s4 }
  0x14   : > { %v300_v4 = vld [vmem:[%s2958_s20] sm:$0xff]  ;;  %v2963_v5 = vpack.c.bf16 %v304_v3, %v301_v2  ;;  %v307_v7 = vld [vmem:[%s2958_s20 + $0x38] sm:$0xff]  ;;  %v310_v8 = vld [vmem:[%s2958_s20 + $0x50] sm:$0xff]  ;;  %s359_s26 = scalar_lea.vmem %s3131_s25, %s1936_s22  ;;  %s1786_s10 = scalar_lea.vmem %s3131_s25, %s1896_s9 }
  0x15   : > { %v2968_v9 = vpack.c.bf16 %v303_v6, %v300_v4  ;;  %v2970_v10 = vpack.c.bf16 %v310_v8, %v307_v7  ;;  %v306_v11 = vld [vmem:[%s2958_s20 + $0x30] sm:$0xff]  ;;  %v309_v12 = vld [vmem:[%s2958_s20 + $0x48] sm:$0xff]  ;;  %v316_v14 = vld [vmem:[%s2958_s20 + $0x80] sm:$0xff]  ;;  %s1790_s16 = scalar_lea.vmem %s3146_s7, %s1900_s11  ;;  %s1902_s17 = smul.u32 72, %s2893_s12 }
  0x16   : > { %v313_v13 = vld [vmem:[%s2958_s20 + $0x68] sm:$0xff]  ;;  %2355 = vmatprep.subr.bf16.mxu0 %v2963_v5  ;;  %v2978_v15 = vpack.c.bf16 %v309_v12, %v306_v11  ;;  %v312_v17 = vld [vmem:[%s2958_s20 + $0x60] sm:$0xff]  ;;  %v315_v18 = vld [vmem:[%s2958_s20 + $0x78] sm:$0xff]  ;;  %s1801_s21 = scalar_lea.vmem %s3131_s25, %s1906_s19  ;;  %s1911_s22 = sshll.u32 %s2893_s12, 3 }
  0x17   : > { %2357 = vmatpush1.bf16.msra.mxu0 %v2968_v9  ;;  %v2981_v16 = vpack.c.bf16 %v316_v14, %v313_v13  ;;  %v319_v19 = vld [vmem:[%s2958_s20 + $0x98] sm:$0xff]  ;;  %v322_v20 = vld [vmem:[%s2958_s20 + $0xb0] sm:$0xff]  ;;  %v305_v22 = vld [vmem:[%s2958_s20 + $0x28] sm:$0xff]  ;;  %v2990_v23 = vpack.c.bf16 %v315_v18, %v312_v17  ;;  %s1794_s18 = scalar_lea.vmem %s3131_s25, %s1902_s17  ;;  %s1804_s23 = scalar_lea.vmem %s3146_s7, %s1911_s22 }
  0x18   : > { %2359 = vmatprep.subr.bf16.mxu0 %v2970_v10  ;;  %v302_v21 = vld [vmem:[%s2958_s20 + $0x10] sm:$0xff]  ;;  %v308_v25 = vld [vmem:[%s2958_s20 + $0x40] sm:$0xff]  ;;  %v2996_v26 = vpack.c.bf16 %v322_v20, %v319_v19  ;;  %v321_v28 = vld [vmem:[%s2958_s20 + $0xa8] sm:$0xff]  ;;  %s1915_s30 = smul.u32 4294967224, %s2893_s12  ;;  %s1816_s6 = scalar_lea.vmem %s3146_s7, %s1919_s5 }
  0x19   : > { %v2992_v24 = vpack.c.bf16 %v305_v22, %v302_v21  ;;  %v318_v27 = vld [vmem:[%s2958_s20 + $0x90] sm:$0xff]  ;;  %v311_v29 = vld [vmem:[%s2958_s20 + $0x58] sm:$0xff]  ;;  %v325_v30 = vld [vmem:[%s2958_s20 + $0xc8] sm:$0xff] }
  0x1a   : > { %v328_v31 = vld [vmem:[%s2958_s20 + $0xe0] sm:$0xff]  ;;  %v3004_v32 = vpack.c.bf16 %v311_v29, %v308_v25  ;;  %v314_v33 = vld [vmem:[%s2958_s20 + $0x70] sm:$0xff]  ;;  %v317_v34 = vld [vmem:[%s2958_s20 + $0x88] sm:$0xff]  ;;  %v3010_v35 = vpack.c.bf16 %v321_v28, %v318_v27  ;;  %s1812_s4 = scalar_lea.vmem %s3131_s25, %s1915_s30 }
  0x1b   : > { %2361 = vmatpush1.bf16.msra.mxu0 %v2978_v15  ;;  %2388 = vmatpush3.bf16.msra.mxu1 %v2992_v24  ;;  %v3013_v36 = vpack.c.bf16 %v328_v31, %v325_v30  ;;  %v324_v37 = vld [vmem:[%s2958_s20 + $0xc0] sm:$0xff]  ;;  %v327_v38 = vld [vmem:[%s2958_s20 + $0xd8] sm:$0xff]  ;;  %v334_v40 = vld [vmem:[%s2958_s20 + $0x110] sm:$0xff]  ;;  %v3020_v41 = vpack.c.bf16 %v317_v34, %v314_v33 }
  0x1c   : > { %2363 = vmatprep.subr.bf16.mxu0 %v2981_v16  ;;  %2389 = vmatprep.subr.bf16.mxu1 %v2903_v0  ;;  %v331_v39 = vld [vmem:[%s2958_s20 + $0xf8] sm:$0xff]  ;;  %v320_v42 = vld [vmem:[%s2958_s20 + $0xa0] sm:$0xff]  ;;  %v3026_v44 = vpack.c.bf16 %v327_v38, %v324_v37  ;;  %v330_v46 = vld [vmem:[%s2958_s20 + $0xf0] sm:$0xff] }
  0x1d   : > { %v323_v43 = vld [vmem:[%s2958_s20 + $0xb8] sm:$0xff]  ;;  %v3029_v45 = vpack.c.bf16 %v334_v40, %v331_v39  ;;  %v333_v47 = vld [vmem:[%s2958_s20 + $0x108] sm:$0xff]  ;;  %v340_v49 = vld [vmem:[%s2958_s20 + $0x140] sm:$0xff] }
  0x1e   : > { %v337_v48 = vld [vmem:[%s2958_s20 + $0x128] sm:$0xff]  ;;  %v3036_v50 = vpack.c.bf16 %v323_v43, %v320_v42  ;;  %v326_v51 = vld [vmem:[%s2958_s20 + $0xd0] sm:$0xff]  ;;  %v3042_v53 = vpack.c.bf16 %v333_v47, %v330_v46  ;;  %v336_v55 = vld [vmem:[%s2958_s20 + $0x120] sm:$0xff] }
  0x1f   : > { %2365 = vmatpush1.bf16.msra.mxu0 %v2990_v23  ;;  %2391 = vmatpush3.bf16.msra.mxu1 %v3004_v32  ;;  %v329_v52 = vld [vmem:[%s2958_s20 + $0xe8] sm:$0xff]  ;;  %v3045_v54 = vpack.c.bf16 %v340_v49, %v337_v48  ;;  %v339_v56 = vld [vmem:[%s2958_s20 + $0x138] sm:$0xff]  ;;  %v346_v58 = vld [vmem:[%s2958_s20 + $0x170] sm:$0xff] }
  0x20   : > { %2367 = vmatprep.subr.bf16.mxu0 %v2996_v26  ;;  %2392 = vmatprep.subr.bf16.mxu1 %v2903_v0  ;;  %v343_v57 = vld [vmem:[%s2958_s20 + $0x158] sm:$0xff]  ;;  %v3052_v59 = vpack.c.bf16 %v329_v52, %v326_v51  ;;  %v332_v60 = vld [vmem:[%s2958_s20 + $0x100] sm:$0xff]  ;;  %v3058_v62 = vpack.c.bf16 %v339_v56, %v336_v55  ;;  %v342_v2 = vld [vmem:[%s2958_s20 + $0x150] sm:$0xff] }
  0x21   : > { %v335_v61 = vld [vmem:[%s2958_s20 + $0x118] sm:$0xff]  ;;  %v3061_v63 = vpack.c.bf16 %v346_v58, %v343_v57  ;;  %v345_v3 = vld [vmem:[%s2958_s20 + $0x168] sm:$0xff]  ;;  %v338_v6 = vld [vmem:[%s2958_s20 + $0x130] sm:$0xff] }
  0x22   : > { %v3066_v4 = vpack.c.bf16 %v335_v61, %v332_v60  ;;  %v341_v7 = vld [vmem:[%s2958_s20 + $0x148] sm:$0xff]  ;;  %v3072_v8 = vpack.c.bf16 %v345_v3, %v342_v2  ;;  %v344_v12 = vld [vmem:[%s2958_s20 + $0x160] sm:$0xff]  ;;  %v347_v13 = vld [vmem:[%s2958_s20 + $0x178] sm:$0xff]  ;;  %s1798_s20 = scalar_lea.vmem %s3146_s7, %s1906_s19 }
  0x23   : > { %2369 = vmatpush1.bf16.msra.mxu0 %v3010_v35  ;;  %2394 = vmatpush3.bf16.msra.mxu1 %v3020_v41  ;;  %v3076_v11 = vpack.c.bf16 %v341_v7, %v338_v6  ;;  %v3084_v14 = vpack.c.bf16 %v347_v13, %v344_v12  ;;  %v360_v17 = vld [vmem:[%s359_s26] sm:$0xff]  ;;  %v361_v25 = vld [vmem:[%s359_s26 + $0x8] sm:$0xff]  ;;  %v362_v38 = vld [vmem:[%s359_s26 + $0x10] sm:$0xff]  ;;  %s1937_s26 = smul.u32 24, %s1030_s24 }
  0x24   : > { %2371 = vmatprep.subr.bf16.mxu0 %v3013_v36  ;;  %2395 = vmatprep.subr.bf16.mxu1 %v2903_v0  ;;  %v3138_v29 = vld [vmem:[%s276_s29] ss:$0 sm:$0xff]  ;;  %v1897_v52 = vld [vmem:[%s1786_s10 + $0x18] sm:$0xff]  ;;  %s1196_s29 = scalar_lea.vmem %s3146_s7, %s1914_s28 }
  0x25   : > { %v1898_v2 = vld [vmem:[%s1786_s10 + $0x20] sm:$0xff]  ;;  %s1033_s27 = scalar_lea.vmem %s3131_s25, %s1937_s26 }
  0x27   : > { %2373 = vmatpush1.bf16.msra.mxu0 %v3026_v44  ;;  %2397 = vmatpush3.bf16.msra.mxu1 %v3036_v50 }
  0x28   : > { %2375 = vmatprep.subr.bf16.mxu0 %v3029_v45  ;;  %2398 = vmatprep.subr.bf16.mxu1 %v2903_v0 }
  0x2b   : > { %2377 = vmatpush1.bf16.msra.mxu0 %v3042_v53  ;;  %2400 = vmatpush3.bf16.msra.mxu1 %v3052_v59 }
  0x2c   : > { %2379 = vmatprep.subr.bf16.mxu0 %v3045_v54  ;;  %2401 = vmatprep.subr.bf16.mxu1 %v2903_v0 }
  0x2f   : > { %2381 = vmatpush1.bf16.msra.mxu0 %v3058_v62  ;;  %2403 = vmatpush3.bf16.msra.mxu1 %v3066_v4 }
  0x30   : > { %2383 = vmatprep.subr.bf16.mxu0 %v3061_v63  ;;  %2404 = vmatprep.subr.bf16.mxu1 %v2903_v0 }
  0x33   : > { %2385 = vmatpush1.bf16.msra.mxu0 %v3072_v8  ;;  %2406 = vmatpush3.bf16.msra.mxu1 %v3076_v11 }
  0x34   : > { %2411 = vmatprep.subr.bf16.mxu0 %v2963_v5  ;;  %2407 = vmatprep.subr.bf16.mxu1 %v2903_v0 }
  0x36   : > { %428 = vmatmul.mubr.f32.vlgmr.msra.gmra.mrb[0].mxu0 %v2904_v1 }
  0x37   : > { %2413 = vmatpush1.bf16.msra.mxu0 %v2968_v9  ;;  %596 = vmatprep.mubr.f32.mxu0 %v2904_v1 }
  0x38   : > { %2415 = vmatprep.subr.bf16.mxu0 %v2970_v10  ;;  %2409 = vmatpush3.bf16.msra.mxu1 %v3084_v14 }
  0x39   : > { %2442 = vmatprep.subr.bf16.mxu1 %v2903_v0 }
  0x3b   : > { %2417 = vmatpush1.bf16.msra.mxu0 %v2978_v15  ;;  %2107 = vmatmul.mubr.f32.vlgmr.msra.gmra.mrb[0].mxu1 %v2904_v1 }
  0x3c   : > { %2419 = vmatprep.subr.bf16.mxu0 %v2981_v16  ;;  %2444 = vmatpush3.bf16.msra.mxu1 %v2992_v24 }
  0x3d   : > { %2141 = vmatprep.mubr.msk.f32.mxu1 %vm2905_vm0, %v2904_v1  ;;  %2445 = vmatprep.subr.bf16.mxu1 %v2903_v0 }
  0x3f   : > { %2421 = vmatpush1.bf16.msra.mxu0 %v2990_v23 }
  0x40   : > { %2423 = vmatprep.subr.bf16.mxu0 %v2996_v26  ;;  %2447 = vmatpush3.bf16.msra.mxu1 %v3004_v32 }
  0x41   : > { %2448 = vmatprep.subr.bf16.mxu1 %v2903_v0 }
  0x43   : > { %2425 = vmatpush1.bf16.msra.mxu0 %v3010_v35 }
  0x44   : > { %2427 = vmatprep.subr.bf16.mxu0 %v3013_v36  ;;  %2450 = vmatpush3.bf16.msra.mxu1 %v3020_v41 }
  0x45   : > { %2451 = vmatprep.subr.bf16.mxu1 %v2903_v0 }
  0x47   : > { %2429 = vmatpush1.bf16.msra.mxu0 %v3026_v44 }
  0x48   : > { %2431 = vmatprep.subr.bf16.mxu0 %v3029_v45  ;;  %2453 = vmatpush3.bf16.msra.mxu1 %v3036_v50 }
  0x49   : > { %2454 = vmatprep.subr.bf16.mxu1 %v2903_v0 }
  0x4b   : > { %2433 = vmatpush1.bf16.msra.mxu0 %v3042_v53 }
  0x4c   : > { %2435 = vmatprep.subr.bf16.mxu0 %v3045_v54  ;;  %2456 = vmatpush3.bf16.msra.mxu1 %v3052_v59 }
  0x4d   : > { %2457 = vmatprep.subr.bf16.mxu1 %v2903_v0 }
  0x4f   : > { %2437 = vmatpush1.bf16.msra.mxu0 %v3058_v62 }
  0x50   : > { %2439 = vmatprep.subr.bf16.mxu0 %v3061_v63  ;;  %2459 = vmatpush3.bf16.msra.mxu1 %v3066_v4 }
  0x51   : > { %2460 = vmatprep.subr.bf16.mxu1 %v2903_v0 }
  0x53   : > { %2441 = vmatpush1.bf16.msra.mxu0 %v3072_v8 }
  0x54   : > { %2467 = vmatprep.subr.bf16.mxu0 %v2963_v5  ;;  %2462 = vmatpush3.bf16.msra.mxu1 %v3076_v11 }
  0x55   : > { %2463 = vmatprep.subr.bf16.mxu1 %v2903_v0 }
  0x58   : > { %2465 = vmatpush3.bf16.msra.mxu1 %v3084_v14 }
  0x59   : > { %2498 = vmatprep.subr.bf16.mxu1 %v2903_v0 }
 0x109   : > { %v429_v18 = vpop.f32.mrb[0].mxu0 }
 0x10a   : > { %v504_v19 = vadd.f32 %v429_v18, %v360_v17  ;;  %v431_v20 = vpop.f32.mrb[1].mxu0  ;;  %v1899_v18 = vld [vmem:[%s1786_s10 + $0x28] sm:$0xff]  ;;  %s1925_s10 = smul.u32 4294967256, %s2893_s12 }
 0x10b   : > { %v505_v28 = vadd.f32 %v431_v20, %v361_v25 }
 0x10c   : > { %v506_v21 = vmul.f32 0.5, %v504_v19  ;;  %s1824_s11 = scalar_lea.vmem %s3146_s7, %s1925_s10 }
 0x10d   : > { %v507_v30 = vmul.f32 0.5, %v505_v28 }
 0x10e   : > { %2831 = vtanh.f32 %v506_v21  ;;  %v500_v22 = vpop.f32.mrb[0].mxu1 }
 0x10f   : > { %v2108_v27 = vpop.f32.mrb[1].mxu1  ;;  %v514_v34 = vadd.f32 %v3138_v29, %v500_v22  ;;  %2833 = vtanh.f32 %v507_v30 }
 0x118   : > { %v2832_v31 = vpop.eup %2831 }
 0x119   : > { %v510_v33 = vmul.f32 0.5, %v2832_v31  ;;  %v2834_v42 = vpop.eup %2833 }
 0x11a   : > { %v511_v43 = vmul.f32 0.5, %v2834_v42 }
 0x11b   : > { %v512_v37 = vadd.f32 0.5, %v510_v33  ;;  %v1903_v33 = vld [vmem:[%s1794_s18 + $0x30] sm:$0xff] }
 0x11c   : > { %v513_v47 = vadd.f32 0.5, %v511_v43  ;;  %v1904_v43 = vld [vmem:[%s1794_s18 + $0x38] sm:$0xff] }
 0x11d   : > { %v515_v39 = vmul.f32 %v514_v34, %v512_v37 }
 0x11f   : > { %v516_v40 = vadd.f32 %v515_v39, %v362_v38 }
 0x121   : > { %2835 = vtanh.f32 %v516_v40 }
 0x12b   : > { %v2836_v46 = vpop.eup %2835 }
 0x12c   : > { %v518_v48 = vsub.f32 0.0, %v2836_v46 }
 0x12e   : > { %v519_v49 = vmul.f32 %v518_v48, %v513_v47 }
 0x130   : > { %v3149_v51 = vadd.f32 %v2836_v46, %v519_v49 }
 0x132   : > { %523 = vst [vmem:[%s522_s8] sm:$0xff] %v3149_v51  ;;  %597 = vmatmul.mubr.f32.vlgmr.msra.gmra.mrb[2].mxu0 %v3149_v51  ;;  %2142 = vmatmul.mubr.f32.vlgmr.msra.gmra.mrb[2].mxu1 %v3149_v51  ;;  %s1921_s8 = smul.u32 4294967176, %s2893_s12 }
 0x133   : > { %2469 = vmatpush1.bf16.msra.mxu0 %v2968_v9  ;;  %2500 = vmatpush3.bf16.msra.mxu1 %v2992_v24 }
 0x134   : > { %2471 = vmatprep.subr.bf16.mxu0 %v2970_v10  ;;  %2501 = vmatprep.subr.bf16.mxu1 %v2903_v0  ;;  %s1820_s9 = scalar_lea.vmem %s3131_s25, %s1921_s8 }
 0x135   : > { %765 = vmatprep.mubr.f32.mxu0 %v2904_v1  ;;  %2176 = vmatprep.mubr.msk.f32.mxu1 %vm2905_vm0, %v2904_v1 }
 0x137   : > { %2473 = vmatpush1.bf16.msra.mxu0 %v2978_v15  ;;  %2503 = vmatpush3.bf16.msra.mxu1 %v3004_v32 }
 0x138   : > { %2475 = vmatprep.subr.bf16.mxu0 %v2981_v16  ;;  %2504 = vmatprep.subr.bf16.mxu1 %v2903_v0 }
 0x13b   : > { %2477 = vmatpush1.bf16.msra.mxu0 %v2990_v23  ;;  %2506 = vmatpush3.bf16.msra.mxu1 %v3020_v41 }
 0x13c   : > { %2479 = vmatprep.subr.bf16.mxu0 %v2996_v26  ;;  %2507 = vmatprep.subr.bf16.mxu1 %v2903_v0 }
 0x13f   : > { %2481 = vmatpush1.bf16.msra.mxu0 %v3010_v35  ;;  %2509 = vmatpush3.bf16.msra.mxu1 %v3036_v50 }
 0x140   : > { %2483 = vmatprep.subr.bf16.mxu0 %v3013_v36  ;;  %2510 = vmatprep.subr.bf16.mxu1 %v2903_v0 }
 0x143   : > { %2485 = vmatpush1.bf16.msra.mxu0 %v3026_v44  ;;  %2512 = vmatpush3.bf16.msra.mxu1 %v3052_v59 }
 0x144   : > { %2487 = vmatprep.subr.bf16.mxu0 %v3029_v45  ;;  %2513 = vmatprep.subr.bf16.mxu1 %v2903_v0 }
 0x147   : > { %2489 = vmatpush1.bf16.msra.mxu0 %v3042_v53  ;;  %2515 = vmatpush3.bf16.msra.mxu1 %v3066_v4 }
 0x148   : > { %2491 = vmatprep.subr.bf16.mxu0 %v3045_v54  ;;  %2516 = vmatprep.subr.bf16.mxu1 %v2903_v0 }
 0x14b   : > { %2493 = vmatpush1.bf16.msra.mxu0 %v3058_v62  ;;  %2518 = vmatpush3.bf16.msra.mxu1 %v3076_v11 }
 0x14c   : > { %2495 = vmatprep.subr.bf16.mxu0 %v3061_v63  ;;  %2519 = vmatprep.subr.bf16.mxu1 %v2903_v0 }
 0x14f   : > { %2497 = vmatpush1.bf16.msra.mxu0 %v3072_v8  ;;  %2521 = vmatpush3.bf16.msra.mxu1 %v3084_v14 }
 0x150   : > { %2523 = vmatprep.subr.bf16.mxu0 %v2963_v5  ;;  %2554 = vmatprep.subr.bf16.mxu1 %v2903_v0 }
 0x205   : > { %v598_v55 = vpop.f32.mrb[2].mxu0  ;;  %v669_v56 = vpop.f32.mrb[2].mxu1 }
 0x206   : > { %v673_v57 = vadd.f32 %v1897_v52, %v598_v55  ;;  %v600_v58 = vpop.f32.mrb[3].mxu0  ;;  %v2143_v60 = vpop.f32.mrb[3].mxu1  ;;  %v683_v17 = vadd.f32 %v3138_v29, %v669_v56  ;;  %v1905_v55 = vld [vmem:[%s1794_s18 + $0x40] sm:$0xff] }
 0x207   : > { %v674_v3 = vadd.f32 %v1898_v2, %v600_v58 }
 0x208   : > { %v675_v61 = vmul.f32 0.5, %v673_v57 }
 0x209   : > { %v676_v6 = vmul.f32 0.5, %v674_v3 }
 0x20a   : > { %2837 = vtanh.f32 %v675_v61 }
 0x20b   : > { %2839 = vtanh.f32 %v676_v6 }
 0x214   : > { %v2838_v7 = vpop.eup %2837 }
 0x215   : > { %v679_v12 = vmul.f32 0.5, %v2838_v7  ;;  %v2840_v21 = vpop.eup %2839 }
 0x216   : > { %v680_v22 = vmul.f32 0.5, %v2840_v21 }
 0x217   : > { %v681_v13 = vadd.f32 0.5, %v679_v12  ;;  %v1908_v12 = vld [vmem:[%s1801_s21 + $0x48] sm:$0xff] }
 0x218   : > { %v682_v27 = vadd.f32 0.5, %v680_v22 }
 0x219   : > { %v684_v19 = vmul.f32 %v683_v17, %v681_v13  ;;  %v1909_v13 = vld [vmem:[%s1801_s21 + $0x50] sm:$0xff] }
 0x21b   : > { %v685_v20 = vadd.f32 %v1899_v18, %v684_v19 }
 0x21d   : > { %2841 = vtanh.f32 %v685_v20 }
 0x227   : > { %v2842_v25 = vpop.eup %2841 }
 0x228   : > { %v687_v28 = vsub.f32 %v3149_v51, %v2842_v25 }
 0x22a   : > { %v688_v30 = vmul.f32 %v687_v28, %v682_v27 }
 0x22c   : > { %v3195_v31 = vadd.f32 %v2842_v25, %v688_v30 }
 0x22e   : > { %1901 = vst [vmem:[%s1790_s16 + $0x8] sm:$0xff] %v3195_v31  ;;  %766 = vmatmul.mubr.f32.vlgmr.msra.gmra.mrb[4].mxu0 %v3195_v31  ;;  %2177 = vmatmul.mubr.f32.vlgmr.msra.gmra.mrb[4].mxu1 %v3195_v31  ;;  %s1927_s16 = smul.u32 4294967128, %s2893_s12 }
 0x22f   : > { %2525 = vmatpush1.bf16.msra.mxu0 %v2968_v9  ;;  %2556 = vmatpush3.bf16.msra.mxu1 %v2992_v24 }
 0x230   : > { %2527 = vmatprep.subr.bf16.mxu0 %v2970_v10  ;;  %2557 = vmatprep.subr.bf16.mxu1 %v2903_v0  ;;  %s1828_s17 = scalar_lea.vmem %s3131_s25, %s1927_s16  ;;  %s1931_s25 = smul.u32 4294967240, %s2893_s12 }
 0x231   : > { %933 = vmatprep.mubr.f32.mxu0 %v2904_v1  ;;  %2211 = vmatprep.mubr.msk.f32.mxu1 %vm2905_vm0, %v2904_v1 }
 0x232   : > { %s1832_s18 = scalar_lea.vmem %s3146_s7, %s1931_s25 }
 0x233   : > { %2529 = vmatpush1.bf16.msra.mxu0 %v2978_v15  ;;  %2559 = vmatpush3.bf16.msra.mxu1 %v3004_v32 }
 0x234   : > { %2531 = vmatprep.subr.bf16.mxu0 %v2981_v16  ;;  %2560 = vmatprep.subr.bf16.mxu1 %v2903_v0 }
 0x237   : > { %2533 = vmatpush1.bf16.msra.mxu0 %v2990_v23  ;;  %2562 = vmatpush3.bf16.msra.mxu1 %v3020_v41 }
 0x238   : > { %2535 = vmatprep.subr.bf16.mxu0 %v2996_v26  ;;  %2563 = vmatprep.subr.bf16.mxu1 %v2903_v0 }
 0x23b   : > { %2537 = vmatpush1.bf16.msra.mxu0 %v3010_v35  ;;  %2565 = vmatpush3.bf16.msra.mxu1 %v3036_v50 }
 0x23c   : > { %2539 = vmatprep.subr.bf16.mxu0 %v3013_v36  ;;  %2566 = vmatprep.subr.bf16.mxu1 %v2903_v0 }
 0x23f   : > { %2541 = vmatpush1.bf16.msra.mxu0 %v3026_v44  ;;  %2568 = vmatpush3.bf16.msra.mxu1 %v3052_v59 }
 0x240   : > { %2543 = vmatprep.subr.bf16.mxu0 %v3029_v45  ;;  %2569 = vmatprep.subr.bf16.mxu1 %v2903_v0 }
 0x243   : > { %2545 = vmatpush1.bf16.msra.mxu0 %v3042_v53  ;;  %2571 = vmatpush3.bf16.msra.mxu1 %v3066_v4 }
 0x244   : > { %2547 = vmatprep.subr.bf16.mxu0 %v3045_v54  ;;  %2572 = vmatprep.subr.bf16.mxu1 %v2903_v0 }
 0x247   : > { %2549 = vmatpush1.bf16.msra.mxu0 %v3058_v62  ;;  %2574 = vmatpush3.bf16.msra.mxu1 %v3076_v11 }
 0x248   : > { %2551 = vmatprep.subr.bf16.mxu0 %v3061_v63  ;;  %2575 = vmatprep.subr.bf16.mxu1 %v2903_v0 }
 0x24b   : > { %2553 = vmatpush1.bf16.msra.mxu0 %v3072_v8  ;;  %2577 = vmatpush3.bf16.msra.mxu1 %v3084_v14 }
 0x24c   : > { %2579 = vmatprep.subr.bf16.mxu0 %v2963_v5  ;;  %2610 = vmatprep.subr.bf16.mxu1 %v2903_v0 }
 0x301   : > { %v767_v34 = vpop.f32.mrb[4].mxu0  ;;  %v838_v37 = vpop.f32.mrb[4].mxu1 }
 0x302   : > { %v842_v38 = vadd.f32 %v1903_v33, %v767_v34  ;;  %v769_v39 = vpop.f32.mrb[5].mxu0  ;;  %v2178_v40 = vpop.f32.mrb[5].mxu1  ;;  %v852_v52 = vadd.f32 %v3138_v29, %v838_v37  ;;  %v1910_v34 = vld [vmem:[%s1801_s21 + $0x58] sm:$0xff] }
 0x303   : > { %v843_v46 = vadd.f32 %v1904_v43, %v769_v39 }
 0x304   : > { %v844_v42 = vmul.f32 0.5, %v842_v38 }
 0x305   : > { %v845_v47 = vmul.f32 0.5, %v843_v46 }
 0x306   : > { %2843 = vtanh.f32 %v844_v42 }
 0x307   : > { %2845 = vtanh.f32 %v845_v47 }
 0x310   : > { %v2844_v48 = vpop.eup %2843 }
 0x311   : > { %v848_v49 = vmul.f32 0.5, %v2844_v48  ;;  %v2846_v58 = vpop.eup %2845 }
 0x312   : > { %v849_v60 = vmul.f32 0.5, %v2846_v58 }
 0x313   : > { %v850_v51 = vadd.f32 0.5, %v848_v49  ;;  %v1034_v49 = vld [vmem:[%s1033_s27] sm:$0xff] }
 0x314   : > { %v851_v2 = vadd.f32 0.5, %v849_v60  ;;  %v1035_v60 = vld [vmem:[%s1033_s27 + $0x8] sm:$0xff] }
 0x315   : > { %v853_v56 = vmul.f32 %v852_v52, %v850_v51 }
 0x317   : > { %v854_v57 = vadd.f32 %v1905_v55, %v853_v56 }
 0x319   : > { %2847 = vtanh.f32 %v854_v57 }
 0x323   : > { %v2848_v61 = vpop.eup %2847 }
 0x324   : > { %v856_v3 = vsub.f32 %v3195_v31, %v2848_v61 }
 0x326   : > { %v857_v6 = vmul.f32 %v856_v3, %v851_v2 }
 0x328   : > { %v3243_v7 = vadd.f32 %v2848_v61, %v857_v6 }
 0x32a   : > { %934 = vmatmul.mubr.f32.vlgmr.msra.gmra.mrb[6].mxu0 %v3243_v7  ;;  %2212 = vmatmul.mubr.f32.vlgmr.msra.gmra.mrb[6].mxu1 %v3243_v7  ;;  %1907 = vst [vmem:[%s1798_s20 + $0x10] sm:$0xff] %v3243_v7 }
 0x32b   : > { %2581 = vmatpush1.bf16.msra.mxu0 %v2968_v9  ;;  %2612 = vmatpush3.bf16.msra.mxu1 %v2992_v24 }
 0x32c   : > { %2583 = vmatprep.subr.bf16.mxu0 %v2970_v10  ;;  %2613 = vmatprep.subr.bf16.mxu1 %v2903_v0 }
 0x32d   : > { %1101 = vmatprep.mubr.f32.mxu0 %v2904_v1  ;;  %2246 = vmatprep.mubr.msk.f32.mxu1 %vm2905_vm0, %v2904_v1 }
 0x32f   : > { %2585 = vmatpush1.bf16.msra.mxu0 %v2978_v15  ;;  %2615 = vmatpush3.bf16.msra.mxu1 %v3004_v32 }
 0x330   : > { %2587 = vmatprep.subr.bf16.mxu0 %v2981_v16  ;;  %2616 = vmatprep.subr.bf16.mxu1 %v2903_v0 }
 0x333   : > { %2589 = vmatpush1.bf16.msra.mxu0 %v2990_v23  ;;  %2618 = vmatpush3.bf16.msra.mxu1 %v3020_v41 }
 0x334   : > { %2591 = vmatprep.subr.bf16.mxu0 %v2996_v26  ;;  %2619 = vmatprep.subr.bf16.mxu1 %v2903_v0 }
 0x337   : > { %2593 = vmatpush1.bf16.msra.mxu0 %v3010_v35  ;;  %2621 = vmatpush3.bf16.msra.mxu1 %v3036_v50 }
 0x338   : > { %2595 = vmatprep.subr.bf16.mxu0 %v3013_v36  ;;  %2622 = vmatprep.subr.bf16.mxu1 %v2903_v0 }
 0x33b   : > { %2597 = vmatpush1.bf16.msra.mxu0 %v3026_v44  ;;  %2624 = vmatpush3.bf16.msra.mxu1 %v3052_v59 }
 0x33c   : > { %2599 = vmatprep.subr.bf16.mxu0 %v3029_v45  ;;  %2625 = vmatprep.subr.bf16.mxu1 %v2903_v0 }
 0x33f   : > { %2601 = vmatpush1.bf16.msra.mxu0 %v3042_v53  ;;  %2627 = vmatpush3.bf16.msra.mxu1 %v3066_v4 }
 0x340   : > { %2603 = vmatprep.subr.bf16.mxu0 %v3045_v54  ;;  %2628 = vmatprep.subr.bf16.mxu1 %v2903_v0 }
 0x343   : > { %2605 = vmatpush1.bf16.msra.mxu0 %v3058_v62  ;;  %2630 = vmatpush3.bf16.msra.mxu1 %v3076_v11 }
 0x344   : > { %2607 = vmatprep.subr.bf16.mxu0 %v3061_v63  ;;  %2631 = vmatprep.subr.bf16.mxu1 %v2903_v0 }
 0x347   : > { %2609 = vmatpush1.bf16.msra.mxu0 %v3072_v8  ;;  %2633 = vmatpush3.bf16.msra.mxu1 %v3084_v14 }
 0x348   : > { %2635 = vmatprep.subr.bf16.mxu0 %v2963_v5  ;;  %2666 = vmatprep.subr.bf16.mxu1 %v2903_v0 }
 0x3fd   : > { %v935_v17 = vpop.f32.mrb[6].mxu0  ;;  %v1006_v18 = vpop.f32.mrb[6].mxu1 }
 0x3fe   : > { %v1010_v19 = vadd.f32 %v1908_v12, %v935_v17  ;;  %v937_v20 = vpop.f32.mrb[7].mxu0  ;;  %v2213_v21 = vpop.f32.mrb[7].mxu1  ;;  %v1020_v33 = vadd.f32 %v3138_v29, %v1006_v18 }
 0x3ff   : > { %v1011_v22 = vadd.f32 %v1909_v13, %v937_v20  ;;  %v1036_v13 = vld [vmem:[%s1033_s27 + $0x10] sm:$0xff] }
 0x400   : > { %v1012_v25 = vmul.f32 0.5, %v1010_v19 }
 0x401   : > { %v1013_v27 = vmul.f32 0.5, %v1011_v22 }
 0x402   : > { %2849 = vtanh.f32 %v1012_v25 }
 0x403   : > { %2851 = vtanh.f32 %v1013_v27 }
 0x40c   : > { %v2850_v28 = vpop.eup %2849 }
 0x40d   : > { %v1016_v30 = vmul.f32 0.5, %v2850_v28  ;;  %v2852_v39 = vpop.eup %2851 }
 0x40e   : > { %v1017_v40 = vmul.f32 0.5, %v2852_v39 }
 0x40f   : > { %v1018_v31 = vadd.f32 0.5, %v1016_v30  ;;  %v1916_v30 = vld [vmem:[%s1812_s4 + $0x78] sm:$0xff] }
 0x410   : > { %v1019_v43 = vadd.f32 0.5, %v1017_v40  ;;  %v1917_v40 = vld [vmem:[%s1812_s4 + $0x80] sm:$0xff] }
 0x411   : > { %v1021_v37 = vmul.f32 %v1020_v33, %v1018_v31 }
 0x413   : > { %v1022_v38 = vadd.f32 %v1910_v34, %v1021_v37 }
 0x415   : > { %2853 = vtanh.f32 %v1022_v38 }
 0x41f   : > { %v2854_v42 = vpop.eup %2853 }
 0x420   : > { %v1024_v46 = vsub.f32 %v3243_v7, %v2854_v42 }
 0x422   : > { %v1025_v47 = vmul.f32 %v1024_v46, %v1019_v43 }
 0x424   : > { %v3290_v48 = vadd.f32 %v2854_v42, %v1025_v47 }
 0x426   : > { %1912 = vst [vmem:[%s1804_s23 + $0x18] sm:$0xff] %v3290_v48  ;;  %1102 = vmatmul.mubr.f32.vlgmr.msra.gmra.mrb[8].mxu0 %v3290_v48  ;;  %2247 = vmatmul.mubr.f32.vlgmr.msra.gmra.mrb[8].mxu1 %v3290_v48 }
 0x427   : > { %2637 = vmatpush1.bf16.msra.mxu0 %v2968_v9  ;;  %2668 = vmatpush3.bf16.msra.mxu1 %v2992_v24 }
 0x428   : > { %2639 = vmatprep.subr.bf16.mxu0 %v2970_v10  ;;  %2669 = vmatprep.subr.bf16.mxu1 %v2903_v0 }
 0x429   : > { %1270 = vmatprep.mubr.f32.mxu0 %v2904_v1  ;;  %2281 = vmatprep.mubr.msk.f32.mxu1 %vm2905_vm0, %v2904_v1 }
 0x42b   : > { %2641 = vmatpush1.bf16.msra.mxu0 %v2978_v15  ;;  %2671 = vmatpush3.bf16.msra.mxu1 %v3004_v32 }
 0x42c   : > { %2643 = vmatprep.subr.bf16.mxu0 %v2981_v16  ;;  %2672 = vmatprep.subr.bf16.mxu1 %v2903_v0 }
 0x42f   : > { %2645 = vmatpush1.bf16.msra.mxu0 %v2990_v23  ;;  %2674 = vmatpush3.bf16.msra.mxu1 %v3020_v41 }
 0x430   : > { %2647 = vmatprep.subr.bf16.mxu0 %v2996_v26  ;;  %2675 = vmatprep.subr.bf16.mxu1 %v2903_v0 }
 0x433   : > { %2649 = vmatpush1.bf16.msra.mxu0 %v3010_v35  ;;  %2677 = vmatpush3.bf16.msra.mxu1 %v3036_v50 }
 0x434   : > { %2651 = vmatprep.subr.bf16.mxu0 %v3013_v36  ;;  %2678 = vmatprep.subr.bf16.mxu1 %v2903_v0 }
 0x437   : > { %2653 = vmatpush1.bf16.msra.mxu0 %v3026_v44  ;;  %2680 = vmatpush3.bf16.msra.mxu1 %v3052_v59 }
 0x438   : > { %2655 = vmatprep.subr.bf16.mxu0 %v3029_v45  ;;  %2681 = vmatprep.subr.bf16.mxu1 %v2903_v0 }
 0x43b   : > { %2657 = vmatpush1.bf16.msra.mxu0 %v3042_v53  ;;  %2683 = vmatpush3.bf16.msra.mxu1 %v3066_v4 }
 0x43c   : > { %2659 = vmatprep.subr.bf16.mxu0 %v3045_v54  ;;  %2684 = vmatprep.subr.bf16.mxu1 %v2903_v0 }
 0x43f   : > { %2661 = vmatpush1.bf16.msra.mxu0 %v3058_v62  ;;  %2686 = vmatpush3.bf16.msra.mxu1 %v3076_v11 }
 0x440   : > { %2663 = vmatprep.subr.bf16.mxu0 %v3061_v63  ;;  %2687 = vmatprep.subr.bf16.mxu1 %v2903_v0 }
 0x443   : > { %2665 = vmatpush1.bf16.msra.mxu0 %v3072_v8  ;;  %2689 = vmatpush3.bf16.msra.mxu1 %v3084_v14 }
 0x444   : > { %2691 = vmatprep.subr.bf16.mxu0 %v2963_v5  ;;  %2722 = vmatprep.subr.bf16.mxu1 %v2903_v0 }
 0x4f9   : > { %v1103_v51 = vpop.f32.mrb[8].mxu0  ;;  %v1174_v52 = vpop.f32.mrb[8].mxu1 }
 0x4fa   : > { %v1178_v55 = vadd.f32 %v1103_v51, %v1034_v49  ;;  %v1105_v56 = vpop.f32.mrb[9].mxu0  ;;  %v2248_v57 = vpop.f32.mrb[9].mxu1  ;;  %v1188_v12 = vadd.f32 %v3138_v29, %v1174_v52  ;;  %v1918_v49 = vld [vmem:[%s1812_s4 + $0x88] sm:$0xff] }
 0x4fb   : > { %v1179_v61 = vadd.f32 %v1105_v56, %v1035_v60 }
 0x4fc   : > { %v1180_v58 = vmul.f32 0.5, %v1178_v55 }
 0x4fd   : > { %v1181_v2 = vmul.f32 0.5, %v1179_v61 }
 0x4fe   : > { %2855 = vtanh.f32 %v1180_v58 }
 0x4ff   : > { %2857 = vtanh.f32 %v1181_v2 }
 0x508   : > { %v2856_v3 = vpop.eup %2855 }
 0x509   : > { %v1184_v6 = vmul.f32 0.5, %v2856_v3  ;;  %v2858_v19 = vpop.eup %2857 }
 0x50a   : > { %v1185_v20 = vmul.f32 0.5, %v2858_v19 }
 0x50b   : > { %v1186_v7 = vadd.f32 0.5, %v1184_v6 }
 0x50c   : > { %v1187_v22 = vadd.f32 0.5, %v1185_v20 }
 0x50d   : > { %v1189_v17 = vmul.f32 %v1188_v12, %v1186_v7 }
 0x50f   : > { %v1190_v18 = vadd.f32 %v1189_v17, %v1036_v13 }
 0x511   : > { %2859 = vtanh.f32 %v1190_v18  ;;  %v1929_v18 = vld [vmem:[%s1828_s17 + $0xb0] sm:$0xff] }
 0x51b   : > { %v2860_v21 = vpop.eup %2859 }
 0x51c   : > { %v1192_v25 = vsub.f32 %v3290_v48, %v2860_v21 }
 0x51e   : > { %v1193_v27 = vmul.f32 %v1192_v25, %v1187_v22 }
 0x520   : > { %v3335_v28 = vadd.f32 %v2860_v21, %v1193_v27 }
 0x522   : > { %1197 = vst [vmem:[%s1196_s29] sm:$0xff] %v3335_v28  ;;  %1271 = vmatmul.mubr.f32.vlgmr.msra.gmra.mrb[10].mxu0 %v3335_v28  ;;  %2282 = vmatmul.mubr.f32.vlgmr.msra.gmra.mrb[10].mxu1 %v3335_v28 }
 0x523   : > { %2693 = vmatpush1.bf16.msra.mxu0 %v2968_v9  ;;  %2724 = vmatpush3.bf16.msra.mxu1 %v2992_v24 }
 0x524   : > { %2695 = vmatprep.subr.bf16.mxu0 %v2970_v10  ;;  %2725 = vmatprep.subr.bf16.mxu1 %v2903_v0 }
 0x525   : > { %1439 = vmatprep.mubr.f32.mxu0 %v2904_v1  ;;  %2316 = vmatprep.mubr.msk.f32.mxu1 %vm2905_vm0, %v2904_v1 }
 0x527   : > { %2697 = vmatpush1.bf16.msra.mxu0 %v2978_v15  ;;  %2727 = vmatpush3.bf16.msra.mxu1 %v3004_v32 }
 0x528   : > { %2699 = vmatprep.subr.bf16.mxu0 %v2981_v16  ;;  %2728 = vmatprep.subr.bf16.mxu1 %v2903_v0 }
 0x52b   : > { %2701 = vmatpush1.bf16.msra.mxu0 %v2990_v23  ;;  %2730 = vmatpush3.bf16.msra.mxu1 %v3020_v41 }
 0x52c   : > { %2703 = vmatprep.subr.bf16.mxu0 %v2996_v26  ;;  %2731 = vmatprep.subr.bf16.mxu1 %v2903_v0 }
 0x52f   : > { %2705 = vmatpush1.bf16.msra.mxu0 %v3010_v35  ;;  %2733 = vmatpush3.bf16.msra.mxu1 %v3036_v50 }
 0x530   : > { %2707 = vmatprep.subr.bf16.mxu0 %v3013_v36  ;;  %2734 = vmatprep.subr.bf16.mxu1 %v2903_v0 }
 0x533   : > { %2709 = vmatpush1.bf16.msra.mxu0 %v3026_v44  ;;  %2736 = vmatpush3.bf16.msra.mxu1 %v3052_v59 }
 0x534   : > { %2711 = vmatprep.subr.bf16.mxu0 %v3029_v45  ;;  %2737 = vmatprep.subr.bf16.mxu1 %v2903_v0 }
 0x537   : > { %2713 = vmatpush1.bf16.msra.mxu0 %v3042_v53  ;;  %2739 = vmatpush3.bf16.msra.mxu1 %v3066_v4 }
 0x538   : > { %2715 = vmatprep.subr.bf16.mxu0 %v3045_v54  ;;  %2740 = vmatprep.subr.bf16.mxu1 %v2903_v0 }
 0x53b   : > { %2717 = vmatpush1.bf16.msra.mxu0 %v3058_v62  ;;  %2742 = vmatpush3.bf16.msra.mxu1 %v3076_v11 }
 0x53c   : > { %2719 = vmatprep.subr.bf16.mxu0 %v3061_v63  ;;  %2743 = vmatprep.subr.bf16.mxu1 %v2903_v0 }
 0x53f   : > { %2721 = vmatpush1.bf16.msra.mxu0 %v3072_v8  ;;  %2745 = vmatpush3.bf16.msra.mxu1 %v3084_v14 }
 0x540   : > { %2747 = vmatprep.subr.bf16.mxu0 %v2963_v5  ;;  %2778 = vmatprep.subr.bf16.mxu1 %v2903_v0 }
 0x5f5   : > { %v1272_v31 = vpop.f32.mrb[10].mxu0  ;;  %v1343_v33 = vpop.f32.mrb[10].mxu1 }
 0x5f6   : > { %v1347_v34 = vadd.f32 %v1916_v30, %v1272_v31  ;;  %v1274_v37 = vpop.f32.mrb[11].mxu0  ;;  %v2283_v38 = vpop.f32.mrb[11].mxu1  ;;  %v1357_v48 = vadd.f32 %v3138_v29, %v1343_v33 }
 0x5f7   : > { %v1348_v42 = vadd.f32 %v1917_v40, %v1274_v37 }
 0x5f8   : > { %v1349_v39 = vmul.f32 0.5, %v1347_v34 }
 0x5f9   : > { %v1350_v43 = vmul.f32 0.5, %v1348_v42 }
 0x5fa   : > { %2861 = vtanh.f32 %v1349_v39 }
 0x5fb   : > { %2863 = vtanh.f32 %v1350_v43 }
 0x604   : > { %v2862_v46 = vpop.eup %2861 }
 0x605   : > { %v1353_v47 = vmul.f32 0.5, %v2862_v46  ;;  %v2864_v55 = vpop.eup %2863 }
 0x606   : > { %v1354_v56 = vmul.f32 0.5, %v2864_v55 }
 0x607   : > { %v1355_v5 = vadd.f32 0.5, %v1353_v47 }
 0x608   : > { %v1356_v58 = vadd.f32 0.5, %v1354_v56 }
 0x609   : > { %v1358_v51 = vmul.f32 %v1357_v48, %v1355_v5 }
 0x60b   : > { %v1359_v52 = vadd.f32 %v1918_v49, %v1358_v51 }
 0x60d   : > { %2865 = vtanh.f32 %v1359_v52 }
 0x617   : > { %v2866_v57 = vpop.eup %2865 }
 0x618   : > { %v1361_v60 = vsub.f32 %v3335_v28, %v2866_v57  ;;  %v1930_v28 = vld [vmem:[%s1828_s17 + $0xb8] sm:$0xff] }
 0x61a   : > { %v1362_v61 = vmul.f32 %v1361_v60, %v1356_v58 }
 0x61c   : > { %v3381_v2 = vadd.f32 %v2866_v57, %v1362_v61 }
 0x61e   : > { %1920 = vst [vmem:[%s1816_s6 + $0x28] sm:$0xff] %v3381_v2  ;;  %1440 = vmatmul.mubr.f32.vlgmr.msra.gmra.mrb[12].mxu0 %v3381_v2  ;;  %2317 = vmatmul.mubr.f32.vlgmr.msra.gmra.mrb[12].mxu1 %v3381_v2 }
 0x61f   : > { %2749 = vmatpush1.bf16.msra.mxu0 %v2968_v9  ;;  %2780 = vmatpush3.bf16.msra.mxu1 %v2992_v24 }
 0x620   : > { %2751 = vmatprep.subr.bf16.mxu0 %v2970_v10  ;;  %2781 = vmatprep.subr.bf16.mxu1 %v2903_v0 }
 0x621   : > { %1608 = vmatprep.mubr.f32.mxu0 %v2904_v1  ;;  %2351 = vmatprep.mubr.msk.f32.mxu1 %vm2905_vm0, %v2904_v1  ;;  %v1922_v1 = vld [vmem:[%s1820_s9 + $0x90] sm:$0xff] }
 0x623   : > { %2753 = vmatpush1.bf16.msra.mxu0 %v2978_v15  ;;  %2783 = vmatpush3.bf16.msra.mxu1 %v3004_v32 }
 0x624   : > { %2755 = vmatprep.subr.bf16.mxu0 %v2981_v16  ;;  %2784 = vmatprep.subr.bf16.mxu1 %v2903_v0 }
 0x627   : > { %2757 = vmatpush1.bf16.msra.mxu0 %v2990_v23  ;;  %2786 = vmatpush3.bf16.msra.mxu1 %v3020_v41 }
 0x628   : > { %2759 = vmatprep.subr.bf16.mxu0 %v2996_v26  ;;  %2787 = vmatprep.subr.bf16.mxu1 %v2903_v0  ;;  %v1923_v26 = vld [vmem:[%s1820_s9 + $0x98] sm:$0xff] }
 0x62b   : > { %2761 = vmatpush1.bf16.msra.mxu0 %v3010_v35  ;;  %2789 = vmatpush3.bf16.msra.mxu1 %v3036_v50 }
 0x62c   : > { %2763 = vmatprep.subr.bf16.mxu0 %v3013_v36  ;;  %2790 = vmatprep.subr.bf16.mxu1 %v2903_v0 }
 0x62f   : > { %2765 = vmatpush1.bf16.msra.mxu0 %v3026_v44  ;;  %2792 = vmatpush3.bf16.msra.mxu1 %v3052_v59 }
 0x630   : > { %2767 = vmatprep.subr.bf16.mxu0 %v3029_v45  ;;  %2793 = vmatprep.subr.bf16.mxu1 %v2903_v0  ;;  %v1924_v45 = vld [vmem:[%s1820_s9 + $0xa0] sm:$0xff] }
 0x633   : > { %2769 = vmatpush1.bf16.msra.mxu0 %v3042_v53  ;;  %2795 = vmatpush3.bf16.msra.mxu1 %v3066_v4 }
 0x634   : > { %2771 = vmatprep.subr.bf16.mxu0 %v3045_v54  ;;  %2796 = vmatprep.subr.bf16.mxu1 %v2903_v0 }
 0x637   : > { %2773 = vmatpush1.bf16.msra.mxu0 %v3058_v62  ;;  %2798 = vmatpush3.bf16.msra.mxu1 %v3076_v11 }
 0x638   : > { %2775 = vmatprep.subr.bf16.mxu0 %v3061_v63  ;;  %2799 = vmatprep.subr.bf16.mxu1 %v2903_v0 }
 0x63b   : > { %2777 = vmatpush1.bf16.msra.mxu0 %v3072_v8  ;;  %2801 = vmatpush3.bf16.msra.mxu1 %v3084_v14  ;;  %v1928_v14 = vld [vmem:[%s1828_s17 + $0xa8] sm:$0xff] }
 0x6f1   : > { %v1441_v9 = vpop.f32.mrb[12].mxu0  ;;  %v1512_v10 = vpop.f32.mrb[12].mxu1 }
 0x6f2   : > { %v1516_v15 = vadd.f32 %v1922_v1, %v1441_v9  ;;  %v1443_v16 = vpop.f32.mrb[13].mxu0  ;;  %v2318_v23 = vpop.f32.mrb[13].mxu1  ;;  %v1526_v44 = vadd.f32 %v3138_v29, %v1512_v10 }
 0x6f3   : > { %v1517_v32 = vadd.f32 %v1923_v26, %v1443_v16 }
 0x6f4   : > { %v1518_v24 = vmul.f32 0.5, %v1516_v15 }
 0x6f5   : > { %v1519_v35 = vmul.f32 0.5, %v1517_v32 }
 0x6f6   : > { %2867 = vtanh.f32 %v1518_v24 }
 0x6f7   : > { %2869 = vtanh.f32 %v1519_v35 }
 0x700   : > { %v2868_v36 = vpop.eup %2867 }
 0x701   : > { %v1522_v0 = vmul.f32 0.5, %v2868_v36  ;;  %v2870_v54 = vpop.eup %2869 }
 0x702   : > { %v1523_v59 = vmul.f32 0.5, %v2870_v54 }
 0x703   : > { %v1524_v41 = vadd.f32 0.5, %v1522_v0 }
 0x704   : > { %v1525_v63 = vadd.f32 0.5, %v1523_v59 }
 0x705   : > { %v1527_v50 = vmul.f32 %v1526_v44, %v1524_v41 }
 0x707   : > { %v1528_v53 = vadd.f32 %v1924_v45, %v1527_v50 }
 0x709   : > { %2871 = vtanh.f32 %v1528_v53 }
 0x713   : > { %v2872_v62 = vpop.eup %2871 }
 0x714   : > { %v1530_v4 = vsub.f32 %v3381_v2, %v2872_v62 }
 0x716   : > { %v1531_v8 = vmul.f32 %v1530_v4, %v1525_v63 }
 0x718   : > { %v1532_v11 = vadd.f32 %v2872_v62, %v1531_v8 }
 0x71a   : > { %1926 = vst [vmem:[%s1824_s11 + $0x30] sm:$0xff] %v1532_v11  ;;  %1609 = vmatmul.mubr.f32.vlgmr.msra.gmra.mrb[14].mxu0 %v1532_v11  ;;  %2352 = vmatmul.mubr.f32.vlgmr.msra.gmra.mrb[14].mxu1 %v1532_v11 }
 0x7ed   : > { %v1610_v3 = vpop.f32.mrb[14].mxu0  ;;  %v1681_v6 = vpop.f32.mrb[14].mxu1 }
 0x7ee   : > { %v1685_v7 = vadd.f32 %v1928_v14, %v1610_v3  ;;  %v1612_v12 = vpop.f32.mrb[15].mxu0  ;;  %v2353_v13 = vpop.f32.mrb[15].mxu1  ;;  %v1695_v27 = vadd.f32 %v3138_v29, %v1681_v6 }
 0x7ef   : > { %v1686_v19 = vadd.f32 %v1929_v18, %v1612_v12 }
 0x7f0   : > { %v1687_v17 = vmul.f32 0.5, %v1685_v7 }
 0x7f1   : > { %v1688_v20 = vmul.f32 0.5, %v1686_v19 }
 0x7f2   : > { %2873 = vtanh.f32 %v1687_v17 }
 0x7f3   : > { %2875 = vtanh.f32 %v1688_v20 }
 0x7fc   : > { %v2874_v21 = vpop.eup %2873 }
 0x7fd   : > { %v1691_v22 = vmul.f32 0.5, %v2874_v21  ;;  %v2876_v33 = vpop.eup %2875 }
 0x7fe   : > { %v1692_v34 = vmul.f32 0.5, %v2876_v33 }
 0x7ff   : > { %v1693_v25 = vadd.f32 0.5, %v1691_v22 }
 0x800   : > { %v1694_v38 = vadd.f32 0.5, %v1692_v34 }
 0x801   : > { %v1696_v30 = vmul.f32 %v1695_v27, %v1693_v25 }
 0x803   : > { %v1697_v31 = vadd.f32 %v1930_v28, %v1696_v30 }
 0x805   : > { %2877 = vtanh.f32 %v1697_v31 }
 0x80f   : > { %v2878_v37 = vpop.eup %2877 }
 0x810   : > { %v1699_v39 = vsub.f32 %v1532_v11, %v2878_v37 }
 0x812   : > { %v1700_v40 = vmul.f32 %v1699_v39, %v1694_v38 }
 0x814   : > { %v1701_v42 = vadd.f32 %v2878_v37, %v1700_v40 }
 0x816   : > { %1932 = vst [vmem:[%s1832_s18 + $0x38] sm:$0xff] %v1701_v42 }
 0x817 PF: > { %s13_s14 = sadd.s32 1, %s2901_s14   ;;  %s3443_s12 = smov %s2897_s13 }
 0x818   : > { %p10_p5 = scmp.ge.s32.totalorder %s13_s14, 4   ;;  %s3444_s13 = smov %s3446_s15 }
 0x81a   :  { %12 = sbr.rel (!%p10_p5) target bundleno = 2 (0x2), region = 88 }

</bundles_post_ra>
